<compile_context>
chip_gen: v7x
topology: tpu7x:2x2x1
jax: 0.10.0
libtpu: 0.0.40
codegen_flags: <defaults>
</compile_context>

<pallas_src>
import functools

import jax
import jax.numpy as jnp
from jax.experimental import pallas as pl
from jax.experimental.pallas import tpu as pltpu

BN_EPS = 1e-5
LRELU_SLOPE = 0.33
LANE = 128      # num_hidden (module default) == TPU lane width
TILE_M = 256    # rows per grid step; live set is a few hundred KiB, well inside v5e's 16 MiB
                # scoped-VMEM default and v7x's 64 MiB physical VMEM.


def _momentum_kernel(nrows_ref, x_ref, w_ref, v_ref, o_ref, stats_ref,
                     *, num_input, num_output, tile_m):
    p = pl.program_id(0)        # 0 = BN-stats pass, 1 = compute pass
    i = pl.program_id(1)        # row-tile index
    true_n = nrows_ref[0]       # real batch size (pad rows are excluded from BN stats)

    # ---- layer 1 + LeakyReLU (recomputed in both passes; cheap since K_eff = num_input) ----
    x = x_ref[...].astype(jnp.bfloat16)                     # bf16 operands, f32 accumulation
    w1 = w_ref[0, :num_input, :]                            # static slice; padded rows never read
    h1 = jnp.dot(x, w1, preferred_element_type=jnp.float32) + v_ref[0:1, :]
    h1 = jnp.maximum(h1, LRELU_SLOPE * h1)                  # LeakyReLU(0.33), single VPU op

    @pl.when(p == 0)
    def _stats_pass():
        @pl.when(i == 0)
        def _init():
            stats_ref[...] = jnp.zeros_like(stats_ref)
        # Mask pad rows (global row id >= true_n) out of the batch statistics.
        row_ids = jax.lax.broadcasted_iota(jnp.int32, (tile_m, LANE), 0) + i * tile_m
        valid = (row_ids < true_n).astype(jnp.float32)
        hm = h1 * valid
        stats_ref[0:1, :] += jnp.sum(hm, axis=0, keepdims=True)        # per-feature sum
        stats_ref[1:2, :] += jnp.sum(hm * h1, axis=0, keepdims=True)   # per-feature sum of squares

    @pl.when(p == 1)
    def _compute_pass():
        # norm2: BatchNorm1d (training-mode batch stats) folded into one scale/offset per feature;
        # applied only when the true batch size > 1 (runtime gate, matches the PyTorch forward).
        inv_n = 1.0 / true_n.astype(jnp.float32)
        mean = stats_ref[0:1, :] * inv_n
        var = jnp.maximum(stats_ref[1:2, :] * inv_n - mean * mean, 0.0)
        gamma, beta = v_ref[3:4, :], v_ref[4:5, :]
        scale = gamma * jax.lax.rsqrt(var + BN_EPS)         # rsqrt -> EUP slot
        offset = beta - mean * scale
        apply_bn = (true_n > 1).astype(jnp.float32)
        scale = apply_bn * scale + (1.0 - apply_bn)         # N == 1 -> identity (BN skipped)
        offset = apply_bn * offset
        h = h1 * scale + offset                             # folded BN, f32 VPU math

        # layer 2 + LeakyReLU
        h = jnp.dot(h.astype(jnp.bfloat16), w_ref[1],
                    preferred_element_type=jnp.float32) + v_ref[1:2, :]
        h = jnp.maximum(h, LRELU_SLOPE * h)

        # layer 3 (+ Identity final); compute lane-dense, store only the real output columns.
        out = jnp.dot(h.astype(jnp.bfloat16), w_ref[2],
                      preferred_element_type=jnp.float32) + v_ref[2:3, :]
        o_ref[...] = out[:, :num_output]


def pack_params(params):
    """Pack (w1, b1, gamma2, beta2, w2, b2, w3, b3) into lane-dense stacks.

    Weights are stored as (in_features, out_features) (already transposed vs. PyTorch), so the
    kernel computes x @ W + b.  Matmul operands are bf16 (MXU-native on v6e/v7x); biases and the
    BatchNorm affine parameters stay f32 for the VPU/EUP math.
    """
    w1, b1, gamma2, beta2, w2, b2, w3, b3 = params
    num_input, num_hidden = w1.shape
    num_output = w3.shape[1]
    assert num_hidden == LANE, "packing assumes num_hidden == 128 (module default)"
    assert num_input <= LANE and num_output <= LANE

    w1p = jnp.pad(w1, ((0, LANE - num_input), (0, 0)))      # padded rows never touched (static slice)
    w3p = jnp.pad(w3, ((0, 0), (0, LANE - num_output)))     # padded cols dropped before the store
    w_stack = jnp.stack([w1p, w2, w3p]).astype(jnp.bfloat16)            # (3, 128, 128) bf16

    b3p = jnp.pad(b3, ((0, 0), (0, LANE - num_output)))
    v_stack = jnp.concatenate(
        [b1, b2, b3p, gamma2, beta2, jnp.zeros((3, LANE), jnp.float32)],
        axis=0).astype(jnp.float32)                                      # (8, 128) f32
    return w_stack, v_stack, num_input, num_output


def momentum_net(x, w_stack, v_stack, num_input, num_output, *, tile_m=TILE_M):
    n = x.shape[0]
    n_pad = ((n + tile_m - 1) // tile_m) * tile_m     # bucket N -> recompile only per bucket
    n_tiles = n_pad // tile_m
    x = x.astype(jnp.float32)
    if n_pad != n:
        x = jnp.pad(x, ((0, n_pad - n), (0, 0)))
    nrows = jnp.array([n], jnp.int32)                 # true batch size, prefetched into SMEM

    kernel = functools.partial(_momentum_kernel, num_input=num_input,
                               num_output=num_output, tile_m=tile_m)
    grid_spec = pltpu.PrefetchScalarGridSpec(
        num_scalar_prefetch=1,
        grid=(2, n_tiles),                            # (pass, row tile); pass axis is outermost
        in_specs=[
            pl.BlockSpec((tile_m, num_input), lambda p, i, nr: (i, 0)),   # x tile, read each pass
            pl.BlockSpec((3, LANE, LANE), lambda p, i, nr: (0, 0, 0)),    # weight stack, resident
            pl.BlockSpec((8, LANE), lambda p, i, nr: (0, 0)),             # bias/BN-affine, resident
        ],
        # During the stats pass the output block index is pinned to tile 0, so no block-index change
        # (and no HBM write-back) happens until pass 1 has fully written each block exactly once.
        out_specs=pl.BlockSpec((tile_m, num_output), lambda p, i, nr: (i * p, 0)),
        scratch_shapes=[pltpu.VMEM((2, LANE), jnp.float32)],              # BN sum / sum-of-squares
    )

    flops = n_pad * (4 * num_input * LANE + 2 * LANE * LANE + 2 * LANE * LANE)
    bytes_accessed = (2 * n_pad * num_input * 4 + 3 * LANE * LANE * 2
                      + 8 * LANE * 4 + n_pad * num_output * 4)
    out = pl.pallas_call(
        kernel,
        out_shape=jax.ShapeDtypeStruct((n_pad, num_output), jnp.float32),
        grid_spec=grid_spec,
        # BN stats are accumulated across row tiles in pass 0 and consumed in pass 1, so both grid
        # axes stay "arbitrary" (sequential) for correctness.
        compiler_params=pltpu.CompilerParams(
            dimension_semantics=("arbitrary", "arbitrary"),
            vmem_limit_bytes=32 * 1024 * 1024),
        cost_estimate=pl.CostEstimate(flops=flops, transcendentals=LANE * n_tiles,
                                      bytes_accessed=bytes_accessed),
    )(nrows, x, w_stack, v_stack)
    return out[:n]


def make_params(key, num_input, num_hidden=128, num_output=1):
    """Deterministic synthetic parameters (shapes match the PyTorch module)."""
    k = jax.random.split(key, 8)

    def lin(kw, kb, fan_in, fan_out):
        bound = 1.0 / (fan_in ** 0.5)
        w = jax.random.uniform(kw, (fan_in, fan_out), jnp.float32, -bound, bound)
        b = jax.random.uniform(kb, (1, fan_out), jnp.float32, -bound, bound)
        return w, b

    w1, b1 = lin(k[0], k[1], num_input, num_hidden)
    gamma2 = 1.0 + 0.1 * jax.random.normal(k[2], (1, num_hidden), jnp.float32)
    beta2 = 0.1 * jax.random.normal(k[3], (1, num_hidden), jnp.float32)
    w2, b2 = lin(k[4], k[5], num_hidden, num_hidden)
    w3, b3 = lin(k[6], k[7], num_hidden, num_output)
    return (w1, b1, gamma2, beta2, w2, b2, w3, b3)


def momentum_net_ref(x, params):
    """Pure-JAX f32 reference mirroring the PyTorch forward."""
    w1, b1, gamma2, beta2, w2, b2, w3, b3 = params
    # norm1(x) is called in the PyTorch forward but its result is discarded -> no effect here.
    h = x @ w1 + b1
    h = jnp.where(h >= 0, h, LRELU_SLOPE * h)
    if x.shape[0] > 1:
        mean = jnp.mean(h, axis=0, keepdims=True)
        var = jnp.mean(jnp.square(h - mean), axis=0, keepdims=True)
        h = (h - mean) / jnp.sqrt(var + BN_EPS) * gamma2 + beta2
    h = h @ w2 + b2
    h = jnp.where(h >= 0, h, LRELU_SLOPE * h)
    return h @ w3 + b3  # final = Identity()


if __name__ == "__main__":
    # MomentumNet(num_input=16, num_output=1, num_hidden=128)
    NUM_INPUT, NUM_HIDDEN, NUM_OUTPUT = 16, 128, 1

    key = jax.random.PRNGKey(0)
    key_x, key_p = jax.random.split(key)
    params = make_params(key_p, NUM_INPUT, NUM_HIDDEN, NUM_OUTPUT)
    w_stack, v_stack, num_input, num_output = pack_params(params)

    # The same compiled kernel serves all of these (N is bucketed; the true N travels via SMEM):
    #   N=16 (baseline), N=13 (odd -> exercises pad-row masking of BN stats), N=1 (BN skipped).
    for n in (16, 13, 1):
        x = jax.random.normal(jax.random.fold_in(key_x, n), (n, NUM_INPUT), jnp.float32)
        out = jax.block_until_ready(
            momentum_net(x, w_stack, v_stack, num_input, num_output))
        ref = momentum_net_ref(x, params)
        assert out.shape == (n, NUM_OUTPUT)
        # bf16 matmul operands with f32 accumulation -> ~1e-3-level absolute error vs. f32 reference.
        err = float(jnp.max(jnp.abs(out - ref)))
        assert jnp.allclose(out, ref, atol=3e-2, rtol=3e-2), err

    print("KERNEL_OK")
</pallas_src>

<mosaic_0001>
module attributes {stable_mosaic.version = 11 : i64} {
  func.func @_momentum_kernel(%arg0: i32, %arg1: i32, %arg2: memref<1xi32, #tpu.memory_space<smem>>, %arg3: memref<256x16xf32, #tpu.memory_space<vmem>>, %arg4: memref<3x128x128xbf16, #tpu.memory_space<vmem>>, %arg5: memref<8x128xf32, #tpu.memory_space<vmem>>, %arg6: memref<256x1xf32, #tpu.memory_space<vmem>>, %arg7: memref<2x128xf32, #tpu.memory_space<vmem>>) attributes {dimension_semantics = [#tpu.dimension_semantics<arbitrary>, #tpu.dimension_semantics<arbitrary>], iteration_bounds = array<i64: 2, 1>, scalar_prefetch = 1 : i64, scratch_operands = 1 : i64, tpu.core_type = #tpu.core_type<tc>, window_params = [{transform_indices = @transform_0, window_bounds = array<i64: 256, 16>}, {pipeline_mode = #tpu.pipeline_mode<synchronous>, transform_indices = @transform_1, window_bounds = array<i64: 3, 128, 128>}, {pipeline_mode = #tpu.pipeline_mode<synchronous>, transform_indices = @transform_2, window_bounds = array<i64: 8, 128>}, {transform_indices = @transform_3, window_bounds = array<i64: 256, 1>}]} {
    %c0 = arith.constant 0 : index
    %0 = memref.load %arg2[%c0] : memref<1xi32, #tpu.memory_space<smem>>
    %c0_0 = arith.constant 0 : index
    %c0_1 = arith.constant 0 : index
    %1 = vector.load %arg3[%c0_0, %c0_1] : memref<256x16xf32, #tpu.memory_space<vmem>>, vector<256x16xf32>
    %2 = arith.truncf %1 : vector<256x16xf32> to vector<256x16xbf16>
    %c0_2 = arith.constant 0 : index
    %c0_3 = arith.constant 0 : index
    %c0_4 = arith.constant 0 : index
    %3 = vector.load %arg4[%c0_2, %c0_3, %c0_4] : memref<3x128x128xbf16, #tpu.memory_space<vmem>>, vector<1x16x128xbf16>
    %4 = vector.shape_cast %3 : vector<1x16x128xbf16> to vector<16x128xbf16>
    %cst = arith.constant dense<0.000000e+00> : vector<256x128xf32>
    %5 = tpu.matmul %2, %4, %cst {dimension_numbers = #tpu.dot_dimension_numbers<[1], [0], [0], [1], [0, 0, 1, 1], [], []>} : vector<256x16xbf16>, vector<16x128xbf16>, vector<256x128xf32> -> vector<256x128xf32>
    %c0_5 = arith.constant 0 : index
    %c0_6 = arith.constant 0 : index
    %6 = vector.load %arg5[%c0_5, %c0_6] : memref<8x128xf32, #tpu.memory_space<vmem>>, vector<1x128xf32>
    %7 = vector.broadcast %6 : vector<1x128xf32> to vector<256x128xf32>
    %8 = arith.addf %5, %7 : vector<256x128xf32>
    %cst_7 = arith.constant 3.300000e-01 : f32
    %9 = vector.broadcast %cst_7 : f32 to vector<256x128xf32>
    %10 = arith.mulf %9, %8 : vector<256x128xf32>
    %11 = arith.maximumf %8, %10 : vector<256x128xf32>
    %c0_i32 = arith.constant 0 : i32
    %12 = arith.cmpi eq, %arg0, %c0_i32 : i32
    %13 = arith.extui %12 : i1 to i32
    %c0_i32_8 = arith.constant 0 : i32
    %14 = arith.cmpi ne, %13, %c0_i32_8 : i32
    scf.if %14 {
      %c0_i32_10 = arith.constant 0 : i32
      %18 = arith.cmpi eq, %arg1, %c0_i32_10 : i32
      %19 = arith.extui %18 : i1 to i32
      %c0_i32_11 = arith.constant 0 : i32
      %20 = arith.cmpi ne, %19, %c0_i32_11 : i32
      scf.if %20 {
        %cst_21 = arith.constant 0.000000e+00 : f32
        %41 = vector.broadcast %cst_21 : f32 to vector<2x128xf32>
        %c0_22 = arith.constant 0 : index
        %c0_23 = arith.constant 0 : index
        %42 = vector.load %arg7[%c0_22, %c0_23] : memref<2x128xf32, #tpu.memory_space<vmem>>, vector<2x128xf32>
        tpu.vector_store %arg7[%c0_22, %c0_23], %41 {strides = array<i32>} : memref<2x128xf32, #tpu.memory_space<vmem>>, vector<2x128xf32>,
      } else {
      }
      %21 = tpu.iota {dimensions = array<i32: 0>} : vector<256x128xi32>
      %c256_i32 = arith.constant 256 : i32
      %22 = arith.muli %arg1, %c256_i32 : i32
      %23 = vector.broadcast %22 : i32 to vector<256x128xi32>
      %24 = arith.addi %21, %23 : vector<256x128xi32>
      %25 = vector.broadcast %0 : i32 to vector<256x128xi32>
      %26 = arith.cmpi slt, %24, %25 : vector<256x128xi32>
      %27 = arith.extui %26 : vector<256x128xi1> to vector<256x128xi32>
      %28 = arith.sitofp %27 : vector<256x128xi32> to vector<256x128xf32>
      %29 = arith.mulf %11, %28 : vector<256x128xf32>
      %c0_12 = arith.constant 0 : index
      %c0_13 = arith.constant 0 : index
      %30 = vector.load %arg7[%c0_12, %c0_13] : memref<2x128xf32, #tpu.memory_space<vmem>>, vector<1x128xf32>
      %cst_14 = arith.constant dense<0.000000e+00> : vector<128xf32>
      %31 = vector.multi_reduction <add>, %29, %cst_14 [0] : vector<256x128xf32> to vector<128xf32>
      %32 = vector.shape_cast %31 : vector<128xf32> to vector<1x128xf32>
      %33 = arith.addf %30, %32 : vector<1x128xf32>
      %c0_15 = arith.constant 0 : index
      %c0_16 = arith.constant 0 : index
      %34 = vector.load %arg7[%c0_15, %c0_16] : memref<2x128xf32, #tpu.memory_space<vmem>>, vector<1x128xf32>
      tpu.vector_store %arg7[%c0_15, %c0_16], %33 {strides = array<i32>} : memref<2x128xf32, #tpu.memory_space<vmem>>, vector<1x128xf32>,
      %c1 = arith.constant 1 : index
      %c0_17 = arith.constant 0 : index
      %35 = vector.load %arg7[%c1, %c0_17] : memref<2x128xf32, #tpu.memory_space<vmem>>, vector<1x128xf32>
      %36 = arith.mulf %29, %11 : vector<256x128xf32>
      %cst_18 = arith.constant dense<0.000000e+00> : vector<128xf32>
      %37 = vector.multi_reduction <add>, %36, %cst_18 [0] : vector<256x128xf32> to vector<128xf32>
      %38 = vector.shape_cast %37 : vector<128xf32> to vector<1x128xf32>
      %39 = arith.addf %35, %38 : vector<1x128xf32>
      %c1_19 = arith.constant 1 : index
      %c0_20 = arith.constant 0 : index
      %40 = vector.load %arg7[%c1_19, %c0_20] : memref<2x128xf32, #tpu.memory_space<vmem>>, vector<1x128xf32>
      tpu.vector_store %arg7[%c1_19, %c0_20], %39 {strides = array<i32>} : memref<2x128xf32, #tpu.memory_space<vmem>>, vector<1x128xf32>,
    } else {
    }
    %c1_i32 = arith.constant 1 : i32
    %15 = arith.cmpi eq, %arg0, %c1_i32 : i32
    %16 = arith.extui %15 : i1 to i32
    %c0_i32_9 = arith.constant 0 : i32
    %17 = arith.cmpi ne, %16, %c0_i32_9 : i32
    scf.if %17 {
      %18 = arith.sitofp %0 : i32 to f32
      %cst_10 = arith.constant 1.000000e+00 : f32
      %19 = arith.divf %cst_10, %18 : f32
      %c0_11 = arith.constant 0 : index
      %c0_12 = arith.constant 0 : index
      %20 = vector.load %arg7[%c0_11, %c0_12] : memref<2x128xf32, #tpu.memory_space<vmem>>, vector<1x128xf32>
      %21 = vector.broadcast %19 : f32 to vector<1x128xf32>
      %22 = arith.mulf %20, %21 : vector<1x128xf32>
      %c1 = arith.constant 1 : index
      %c0_13 = arith.constant 0 : index
      %23 = vector.load %arg7[%c1, %c0_13] : memref<2x128xf32, #tpu.memory_space<vmem>>, vector<1x128xf32>
      %24 = vector.broadcast %19 : f32 to vector<1x128xf32>
      %25 = arith.mulf %23, %24 : vector<1x128xf32>
      %26 = arith.mulf %22, %22 : vector<1x128xf32>
      %27 = arith.subf %25, %26 : vector<1x128xf32>
      %cst_14 = arith.constant 0.000000e+00 : f32
      %28 = vector.broadcast %cst_14 : f32 to vector<1x128xf32>
      %29 = arith.maximumf %27, %28 : vector<1x128xf32>
      %c3 = arith.constant 3 : index
      %c0_15 = arith.constant 0 : index
      %30 = vector.load %arg5[%c3, %c0_15] : memref<8x128xf32, #tpu.memory_space<vmem>>, vector<1x128xf32>
      %c4 = arith.constant 4 : index
      %c0_16 = arith.constant 0 : index
      %31 = vector.load %arg5[%c4, %c0_16] : memref<8x128xf32, #tpu.memory_space<vmem>>, vector<1x128xf32>
      %cst_17 = arith.constant 9.99999974E-6 : f32
      %32 = vector.broadcast %cst_17 : f32 to vector<1x128xf32>
      %33 = arith.addf %29, %32 : vector<1x128xf32>
      %34 = math.rsqrt %33 : vector<1x128xf32>
      %35 = arith.mulf %30, %34 : vector<1x128xf32>
      %36 = arith.mulf %22, %35 : vector<1x128xf32>
      %37 = arith.subf %31, %36 : vector<1x128xf32>
      %c1_i32_18 = arith.constant 1 : i32
      %38 = arith.cmpi sgt, %0, %c1_i32_18 : i32
      %39 = arith.extui %38 : i1 to i32
      %40 = arith.sitofp %39 : i32 to f32
      %41 = vector.broadcast %40 : f32 to vector<1x128xf32>
      %42 = arith.mulf %41, %35 : vector<1x128xf32>
      %cst_19 = arith.constant 1.000000e+00 : f32
      %43 = arith.subf %cst_19, %40 : f32
      %44 = vector.broadcast %43 : f32 to vector<1x128xf32>
      %45 = arith.addf %42, %44 : vector<1x128xf32>
      %46 = vector.broadcast %40 : f32 to vector<1x128xf32>
      %47 = arith.mulf %46, %37 : vector<1x128xf32>
      %48 = vector.broadcast %45 : vector<1x128xf32> to vector<256x128xf32>
      %49 = arith.mulf %11, %48 : vector<256x128xf32>
      %50 = vector.broadcast %47 : vector<1x128xf32> to vector<256x128xf32>
      %51 = arith.addf %49, %50 : vector<256x128xf32>
      %52 = arith.truncf %51 : vector<256x128xf32> to vector<256x128xbf16>
      %c1_20 = arith.constant 1 : index
      %c0_21 = arith.constant 0 : index
      %c0_22 = arith.constant 0 : index
      %53 = vector.load %arg4[%c1_20, %c0_21, %c0_22] : memref<3x128x128xbf16, #tpu.memory_space<vmem>>, vector<1x128x128xbf16>
      %54 = vector.shape_cast %53 : vector<1x128x128xbf16> to vector<128x128xbf16>
      %cst_23 = arith.constant dense<0.000000e+00> : vector<256x128xf32>
      %55 = tpu.matmul %52, %54, %cst_23 {dimension_numbers = #tpu.dot_dimension_numbers<[1], [0], [0], [1], [0, 0, 1, 1], [], []>} : vector<256x128xbf16>, vector<128x128xbf16>, vector<256x128xf32> -> vector<256x128xf32>
      %c1_24 = arith.constant 1 : index
      %c0_25 = arith.constant 0 : index
      %56 = vector.load %arg5[%c1_24, %c0_25] : memref<8x128xf32, #tpu.memory_space<vmem>>, vector<1x128xf32>
      %57 = vector.broadcast %56 : vector<1x128xf32> to vector<256x128xf32>
      %58 = arith.addf %55, %57 : vector<256x128xf32>
      %cst_26 = arith.constant 3.300000e-01 : f32
      %59 = vector.broadcast %cst_26 : f32 to vector<256x128xf32>
      %60 = arith.mulf %59, %58 : vector<256x128xf32>
      %61 = arith.maximumf %58, %60 : vector<256x128xf32>
      %62 = arith.truncf %61 : vector<256x128xf32> to vector<256x128xbf16>
      %c2 = arith.constant 2 : index
      %c0_27 = arith.constant 0 : index
      %c0_28 = arith.constant 0 : index
      %63 = vector.load %arg4[%c2, %c0_27, %c0_28] : memref<3x128x128xbf16, #tpu.memory_space<vmem>>, vector<1x128x128xbf16>
      %64 = vector.shape_cast %63 : vector<1x128x128xbf16> to vector<128x128xbf16>
      %cst_29 = arith.constant dense<0.000000e+00> : vector<256x128xf32>
      %65 = tpu.matmul %62, %64, %cst_29 {dimension_numbers = #tpu.dot_dimension_numbers<[1], [0], [0], [1], [0, 0, 1, 1], [], []>} : vector<256x128xbf16>, vector<128x128xbf16>, vector<256x128xf32> -> vector<256x128xf32>
      %c2_30 = arith.constant 2 : index
      %c0_31 = arith.constant 0 : index
      %66 = vector.load %arg5[%c2_30, %c0_31] : memref<8x128xf32, #tpu.memory_space<vmem>>, vector<1x128xf32>
      %67 = vector.broadcast %66 : vector<1x128xf32> to vector<256x128xf32>
      %68 = arith.addf %65, %67 : vector<256x128xf32>
      %69 = vector.extract_strided_slice %68 {offsets = [0, 0], sizes = [256, 1], strides = [1, 1]} : vector<256x128xf32> to vector<256x1xf32>
      %c0_32 = arith.constant 0 : index
      %c0_33 = arith.constant 0 : index
      %70 = vector.load %arg6[%c0_32, %c0_33] : memref<256x1xf32, #tpu.memory_space<vmem>>, vector<256x1xf32>
      tpu.vector_store %arg6[%c0_32, %c0_33], %69 {strides = array<i32>} : memref<256x1xf32, #tpu.memory_space<vmem>>, vector<256x1xf32>,
    } else {
    }
    return
  }
  func.func @transform_0(%arg0: i32, %arg1: i32, %arg2: memref<1xi32, #tpu.memory_space<smem>>) -> (i32, i32) {
    %c0_i32 = arith.constant 0 : i32
    %c0_i32_0 = arith.constant 0 : i32
    return %arg1, %c0_i32 : i32, i32
  }
  func.func @transform_1(%arg0: i32, %arg1: i32, %arg2: memref<1xi32, #tpu.memory_space<smem>>) -> (i32, i32, i32) {
    %c0_i32 = arith.constant 0 : i32
    %c0_i32_0 = arith.constant 0 : i32
    %c0_i32_1 = arith.constant 0 : i32
    %c0_i32_2 = arith.constant 0 : i32
    return %c0_i32, %c0_i32_0, %c0_i32_1 : i32, i32, i32
  }
  func.func @transform_2(%arg0: i32, %arg1: i32, %arg2: memref<1xi32, #tpu.memory_space<smem>>) -> (i32, i32) {
    %c0_i32 = arith.constant 0 : i32
    %c0_i32_0 = arith.constant 0 : i32
    %c0_i32_1 = arith.constant 0 : i32
    return %c0_i32, %c0_i32_0 : i32, i32
  }
  func.func @transform_3(%arg0: i32, %arg1: i32, %arg2: memref<1xi32, #tpu.memory_space<smem>>) -> (i32, i32) {
    %0 = arith.muli %arg1, %arg0 : i32
    %c0_i32 = arith.constant 0 : i32
    %c0_i32_0 = arith.constant 0 : i32
    return %0, %c0_i32 : i32, i32
  }
}

</mosaic_0001>

<bundles_post_ra>
// kernel: tpu_custom_call.1
= control target key start
LH: loop header
LB: loop body
LE: loop exit
PB: predicated region body
PF: predicated region fallthrough
CT: control target
= control target key end

     0   :  { %s2022_s17 = smov 0   ;;  %s2024_s18 = smov 0   ;;  %s2795_s0 = inlined_call_operand.<no memory space> [shape: s32[1], index: 0, kind: input, shape index: {}]   ;;  %s2796_s1 = inlined_call_operand.vmem [shape: f32[256,16], index: 1, kind: input, shape index: {}]   ;;  %s2797_s2 = inlined_call_operand.vmem [shape: bf16[3,128,128], index: 2, kind: input, shape index: {}]   ;;  %s2798_s3 = inlined_call_operand.vmem [shape: f32[8,128], index: 3, kind: input, shape index: {}]   ;;  %s2799_s4 = inlined_call_operand.vmem [shape: f32[256,1], index: 4, kind: output, shape index: {}]  }
   0x1   :  { %9 = sst [smem:[#allocation4]] %s2795_s0  ;;  %s2026_s19 = smov 0  }
   0x2 LB: > { %s27_s0 = sadd.s32 1, %s1987_s18  ;;  %p1617_p0 = scmp.ge.s32.totalorder %s1991_s19, 1  ;;  %s1991_s19 = sphi %s2026_s19, %s15_s19   ;;  %s1987_s18 = sphi %s2024_s18, %s2801_s18   ;;  %s1983_s17 = sphi %s2022_s17, %s2800_s17  }
   0x3   : > { %p29_p1 = scmp.ge.s32.totalorder %s27_s0, 2  ;;  %p154_p2 = scmp.lt.s32.totalorder %s1991_s19, 3 }
   0x5   : > { %s2803_s0 = smov (%p29_p1, %s27_s0), 0  ;;  %p155_p3 = pnand %p1617_p0, %p154_p2 }
   0x6   : > { %s2042_s20 = sld [smem:[#allocation4]] (!%p155_p3)  ;;  %v1948_v0 = vld [vmem:[%s2797_s2] sm:$0xff] (!%p155_p3)   ;;  %v196_v2 = vld [vmem:[%s2796_s1 + $0x8] sm:$0xff] (!%p155_p3)  ;;  %vm256_vm0 = vcmask (!%p155_p3), 130048   ;;  %v197_v6 = vld [vmem:[%s2796_s1 + $0x10] sm:$0xff] (!%p155_p3)  ;;  %p1636_p4 = scmp.ne.s32.totalorder (!%p155_p3), %s1983_s17, 0 }
   0x7   : > { %158 = sbr.rel (%p155_p3) target bundleno = 943 (0x3af), region = 32  ;;  %v195_v1 = vld [vmem:[%s2796_s1] sm:$0xff] (!%p155_p3)  ;;  %v212_v5 = vld [vmem:[%s2796_s1 + $0x88] sm:$0xff] (!%p155_p3)  ;;  %1789 = vmatprep.subr.bf16.mxu0 (!%p155_p3), %v1948_v0  ;;  %1919 = vmatprep.subr.bf16.mxu1 (!%p155_p3), %v1948_v0  ;;  %v198_v8 = vld [vmem:[%s2796_s1 + $0x18] sm:$0xff] (!%p155_p3) }
   0x8   : > { %v227_v3 = vpack.c.bf16 (!%p155_p3), %v196_v2, %v195_v1  ;;  %v211_v4 = vld [vmem:[%s2796_s1 + $0x80] sm:$0xff] (!%p155_p3)  ;;  %v213_v9 = vld [vmem:[%s2796_s1 + $0x90] sm:$0xff] (!%p155_p3)  ;;  %v214_v10 = vld [vmem:[%s2796_s1 + $0x98] sm:$0xff] (!%p155_p3)  ;;  %1790 = vmatpush3.bf16.msra.mxu0 (!%p155_p3), %v1948_v0  ;;  %1920 = vmatpush3.bf16.msra.mxu1 (!%p155_p3), %v1948_v0  ;;  %v228_v11 = vpack.c.bf16 (!%p155_p3), %v198_v8, %v197_v6 }
   0x9   : > { %v235_v7 = vpack.c.bf16 (!%p155_p3), %v212_v5, %v211_v4  ;;  %v236_v12 = vpack.c.bf16 (!%p155_p3), %v214_v10, %v213_v9  ;;  %v199_v13 = vld [vmem:[%s2796_s1 + $0x20] sm:$0xff] (!%p155_p3)  ;;  %v200_v14 = vld [vmem:[%s2796_s1 + $0x28] sm:$0xff] (!%p155_p3)  ;;  %v201_v19 = vld [vmem:[%s2796_s1 + $0x30] sm:$0xff] (!%p155_p3) }
   0xa   : > { %v215_v15 = vld [vmem:[%s2796_s1 + $0xa0] sm:$0xff] (!%p155_p3)  ;;  %1791 = vmatprep.mubr.msk.bf16.mxu0 (!%p155_p3), %vm256_vm0, %v227_v3  ;;  %v229_v16 = vpack.c.bf16 (!%p155_p3), %v200_v14, %v199_v13  ;;  %v216_v17 = vld [vmem:[%s2796_s1 + $0xa8] sm:$0xff] (!%p155_p3)  ;;  %v202_v20 = vld [vmem:[%s2796_s1 + $0x38] sm:$0xff] (!%p155_p3) }
   0xb   : > { %1807 = vmatprep.mubr.msk.bf16.mxu1 (!%p155_p3), %vm256_vm0, %v235_v7  ;;  %v237_v18 = vpack.c.bf16 (!%p155_p3), %v216_v17, %v215_v15  ;;  %1792 = vmatmul.mubr.msk.bf16.vlgmr.msra.gmra.mrb[0].mxu0 (!%p155_p3), %vm256_vm0, %v228_v11  ;;  %v217_v21 = vld [vmem:[%s2796_s1 + $0xb0] sm:$0xff] (!%p155_p3)  ;;  %v218_v22 = vld [vmem:[%s2796_s1 + $0xb8] sm:$0xff] (!%p155_p3)  ;;  %v203_v23 = vld [vmem:[%s2796_s1 + $0x40] sm:$0xff] (!%p155_p3)  ;;  %v230_v27 = vpack.c.bf16 (!%p155_p3), %v202_v20, %v201_v19 }
   0xc   : > { %1808 = vmatmul.mubr.msk.bf16.vlgmr.msra.gmra.mrb[0].mxu1 (!%p155_p3), %vm256_vm0, %v236_v12  ;;  %1795 = vmatprep.mubr.msk.bf16.mxu0 (!%p155_p3), %vm256_vm0, %v229_v16  ;;  %v204_v24 = vld [vmem:[%s2796_s1 + $0x48] sm:$0xff] (!%p155_p3)  ;;  %v219_v25 = vld [vmem:[%s2796_s1 + $0xc0] sm:$0xff] (!%p155_p3)  ;;  %v238_v28 = vpack.c.bf16 (!%p155_p3), %v218_v22, %v217_v21  ;;  %v205_v31 = vld [vmem:[%s2796_s1 + $0x50] sm:$0xff] (!%p155_p3) }
   0xd   : > { %1811 = vmatprep.mubr.msk.bf16.mxu1 (!%p155_p3), %vm256_vm0, %v237_v18  ;;  %v220_v26 = vld [vmem:[%s2796_s1 + $0xc8] sm:$0xff] (!%p155_p3)  ;;  %v231_v29 = vpack.c.bf16 (!%p155_p3), %v204_v24, %v203_v23  ;;  %v206_v32 = vld [vmem:[%s2796_s1 + $0x58] sm:$0xff] (!%p155_p3)  ;;  %v221_v33 = vld [vmem:[%s2796_s1 + $0xd0] sm:$0xff] (!%p155_p3) }
   0xe   : > { %v239_v30 = vpack.c.bf16 %v220_v26, %v219_v25  ;;  %v222_v34 = vld [vmem:[%s2796_s1 + $0xd8] sm:$0xff]  ;;  %v207_v35 = vld [vmem:[%s2796_s1 + $0x60] sm:$0xff]  ;;  %v208_v36 = vld [vmem:[%s2796_s1 + $0x68] sm:$0xff]  ;;  %v232_v39 = vpack.c.bf16 %v206_v32, %v205_v31 }
   0xf   : > { %v223_v37 = vld [vmem:[%s2796_s1 + $0xe0] sm:$0xff]  ;;  %v224_v38 = vld [vmem:[%s2796_s1 + $0xe8] sm:$0xff]  ;;  %v240_v40 = vpack.c.bf16 %v222_v34, %v221_v33  ;;  %v233_v41 = vpack.c.bf16 %v208_v36, %v207_v35  ;;  %v209_v43 = vld [vmem:[%s2796_s1 + $0x70] sm:$0xff] }
  0x10   : > { %v241_v42 = vpack.c.bf16 %v224_v38, %v223_v37  ;;  %v210_v44 = vld [vmem:[%s2796_s1 + $0x78] sm:$0xff]  ;;  %v225_v45 = vld [vmem:[%s2796_s1 + $0xf0] sm:$0xff]  ;;  %v2162_v49 = vld [vmem:[%s2798_s3] ss:$0 sm:$0xff] }
  0x11   : > { %v226_v46 = vld [vmem:[%s2796_s1 + $0xf8] sm:$0xff]  ;;  %v234_v47 = vpack.c.bf16 %v210_v44, %v209_v43 }
  0x12   : > { %v242_v48 = vpack.c.bf16 %v226_v46, %v225_v45 }
  0x13   : > { %1796 = vmatmul.mubr.msk.bf16.gmra.mrb[4].mxu0 %vm256_vm0, %v230_v27 }
  0x14   : > { %1812 = vmatmul.mubr.msk.bf16.gmra.mrb[4].mxu1 %vm256_vm0, %v238_v28  ;;  %1799 = vmatprep.mubr.msk.bf16.mxu0 %vm256_vm0, %v231_v29 }
  0x15   : > { %1815 = vmatprep.mubr.msk.bf16.mxu1 %vm256_vm0, %v239_v30 }
  0x1b   : > { %1800 = vmatmul.mubr.msk.bf16.gmra.mrb[8].mxu0 %vm256_vm0, %v232_v39 }
  0x1c   : > { %1816 = vmatmul.mubr.msk.bf16.gmra.mrb[8].mxu1 %vm256_vm0, %v240_v40  ;;  %1803 = vmatprep.mubr.msk.bf16.mxu0 %vm256_vm0, %v233_v41 }
  0x1d   : > { %1819 = vmatprep.mubr.msk.bf16.mxu1 %vm256_vm0, %v241_v42 }
  0x23   : > { %1804 = vmatmul.mubr.msk.bf16.gmra.mrb[12].mxu0 %vm256_vm0, %v234_v47 }
  0x24   : > { %1820 = vmatmul.mubr.msk.bf16.gmra.mrb[12].mxu1 %vm256_vm0, %v242_v48 }
  0xde   : > { %v1793_v50 = vpop.f32.mrb[0].mxu0 }
  0xdf   : > { %v1809_v51 = vpop.f32.mrb[0].mxu1  ;;  %v348_v52 = vadd.f32 %v1793_v50, %v2162_v49  ;;  %v339_v54 = vpop.f32.mrb[1].mxu0 }
  0xe0   : > { %v412_v53 = vadd.f32 %v1809_v51, %v2162_v49  ;;  %v403_v55 = vpop.f32.mrb[1].mxu1  ;;  %v340_v56 = vadd.f32 %v2162_v49, %v339_v54  ;;  %v1794_v58 = vpop.f32.mrb[2].mxu0 }
  0xe1   : > { %v404_v57 = vadd.f32 %v2162_v49, %v403_v55  ;;  %v1810_v59 = vpop.f32.mrb[2].mxu1  ;;  %v468_v60 = vmul.f32 0.33, %v348_v52  ;;  %v351_v62 = vadd.f32 %v1794_v58, %v2162_v49  ;;  %v342_v0 = vpop.f32.mrb[3].mxu0 }
  0xe2   : > { %v484_v61 = vmul.f32 0.33, %v412_v53  ;;  %v415_v63 = vadd.f32 %v1810_v59, %v2162_v49  ;;  %v406_v1 = vpop.f32.mrb[3].mxu1  ;;  %v466_v2 = vmul.f32 0.33, %v340_v56  ;;  %v343_v4 = vadd.f32 %v2162_v49, %v342_v0 }
  0xe3   : > { %v482_v3 = vmul.f32 0.33, %v404_v57  ;;  %v407_v5 = vadd.f32 %v2162_v49, %v406_v1  ;;  %v2172_v6 = vmax.f32 %v348_v52, %v468_v60  ;;  %v469_v8 = vmul.f32 0.33, %v351_v62 }
  0xe4   : > { %v2174_v7 = vmax.f32 %v412_v53, %v484_v61  ;;  %v485_v9 = vmul.f32 0.33, %v415_v63  ;;  %v2176_v10 = vmax.f32 %v340_v56, %v466_v2  ;;  %v467_v12 = vmul.f32 0.33, %v343_v4 }
  0xe5   : > { %v2178_v11 = vmax.f32 %v404_v57, %v482_v3  ;;  %v483_v13 = vmul.f32 0.33, %v407_v5  ;;  %v2180_v14 = vmax.f32 %v351_v62, %v469_v8 }
  0xe6   : > { %v2182_v15 = vmax.f32 %v415_v63, %v485_v9  ;;  %v2184_v16 = vmax.f32 %v343_v4, %v467_v12  ;;  %v1797_v18 = vpop.f32.mrb[4].mxu0 }
  0xe7   : > { %v2186_v17 = vmax.f32 %v407_v5, %v483_v13  ;;  %v1813_v19 = vpop.f32.mrb[4].mxu1  ;;  %v364_v20 = vadd.f32 %v1797_v18, %v2162_v49  ;;  %v355_v22 = vpop.f32.mrb[5].mxu0 }
  0xe8   : > { %v428_v21 = vadd.f32 %v1813_v19, %v2162_v49  ;;  %v419_v23 = vpop.f32.mrb[5].mxu1  ;;  %v356_v24 = vadd.f32 %v2162_v49, %v355_v22  ;;  %v1798_v26 = vpop.f32.mrb[6].mxu0 }
  0xe9   : > { %v420_v25 = vadd.f32 %v2162_v49, %v419_v23  ;;  %v1814_v27 = vpop.f32.mrb[6].mxu1  ;;  %v472_v28 = vmul.f32 0.33, %v364_v20  ;;  %v367_v30 = vadd.f32 %v1798_v26, %v2162_v49  ;;  %v358_v32 = vpop.f32.mrb[7].mxu0 }
  0xea   : > { %v488_v29 = vmul.f32 0.33, %v428_v21  ;;  %v431_v31 = vadd.f32 %v1814_v27, %v2162_v49  ;;  %v422_v33 = vpop.f32.mrb[7].mxu1  ;;  %v470_v34 = vmul.f32 0.33, %v356_v24  ;;  %v359_v36 = vadd.f32 %v2162_v49, %v358_v32 }
  0xeb   : > { %v486_v35 = vmul.f32 0.33, %v420_v25  ;;  %v423_v37 = vadd.f32 %v2162_v49, %v422_v33  ;;  %v2196_v38 = vmax.f32 %v364_v20, %v472_v28  ;;  %v473_v40 = vmul.f32 0.33, %v367_v30 }
  0xec   : > { %v2198_v39 = vmax.f32 %v428_v21, %v488_v29  ;;  %v489_v41 = vmul.f32 0.33, %v431_v31  ;;  %v2200_v42 = vmax.f32 %v356_v24, %v470_v34  ;;  %v471_v44 = vmul.f32 0.33, %v359_v36 }
  0xed   : > { %v2202_v43 = vmax.f32 %v420_v25, %v486_v35  ;;  %v487_v45 = vmul.f32 0.33, %v423_v37  ;;  %v2204_v46 = vmax.f32 %v367_v30, %v473_v40 }
  0xee   : > { %v2206_v47 = vmax.f32 %v431_v31, %v489_v41  ;;  %v2208_v48 = vmax.f32 %v359_v36, %v471_v44  ;;  %v1801_v51 = vpop.f32.mrb[8].mxu0 }
  0xef   : > { %v2210_v50 = vmax.f32 %v423_v37, %v487_v45  ;;  %v1817_v52 = vpop.f32.mrb[8].mxu1  ;;  %v380_v53 = vadd.f32 %v1801_v51, %v2162_v49  ;;  %v371_v55 = vpop.f32.mrb[9].mxu0 }
  0xf0   : > { %v444_v54 = vadd.f32 %v1817_v52, %v2162_v49  ;;  %v435_v56 = vpop.f32.mrb[9].mxu1  ;;  %v372_v57 = vadd.f32 %v2162_v49, %v371_v55  ;;  %v1802_v59 = vpop.f32.mrb[10].mxu0 }
  0xf1   : > { %v436_v58 = vadd.f32 %v2162_v49, %v435_v56  ;;  %v1818_v60 = vpop.f32.mrb[10].mxu1  ;;  %v476_v61 = vmul.f32 0.33, %v380_v53  ;;  %v383_v63 = vadd.f32 %v1802_v59, %v2162_v49  ;;  %v374_v1 = vpop.f32.mrb[11].mxu0 }
  0xf2   : > { %v492_v62 = vmul.f32 0.33, %v444_v54  ;;  %v447_v0 = vadd.f32 %v1818_v60, %v2162_v49  ;;  %v438_v2 = vpop.f32.mrb[11].mxu1  ;;  %v474_v3 = vmul.f32 0.33, %v372_v57  ;;  %v375_v5 = vadd.f32 %v2162_v49, %v374_v1 }
  0xf3   : > { %v490_v4 = vmul.f32 0.33, %v436_v58  ;;  %v439_v8 = vadd.f32 %v2162_v49, %v438_v2  ;;  %v2220_v9 = vmax.f32 %v380_v53, %v476_v61  ;;  %v477_v13 = vmul.f32 0.33, %v383_v63 }
  0xf4   : > { %v2222_v12 = vmax.f32 %v444_v54, %v492_v62  ;;  %v493_v18 = vmul.f32 0.33, %v447_v0  ;;  %v2224_v19 = vmax.f32 %v372_v57, %v474_v3  ;;  %v475_v21 = vmul.f32 0.33, %v375_v5 }
  0xf5   : > { %v2226_v20 = vmax.f32 %v436_v58, %v490_v4  ;;  %v491_v22 = vmul.f32 0.33, %v439_v8  ;;  %v2228_v23 = vmax.f32 %v383_v63, %v477_v13  ;;  %v539_v4 = vlaneseq (!%p1636_p4) }
  0xf6   : > { %v2230_v24 = vmax.f32 %v447_v0, %v493_v18  ;;  %v2232_v25 = vmax.f32 %v375_v5, %v475_v21  ;;  %v1805_v27 = vpop.f32.mrb[12].mxu0  ;;  %v2266_v13 = vstv (!%p1636_p4), %s2042_s20 }
  0xf7   : > { %v2234_v26 = vmax.f32 %v439_v8, %v491_v22  ;;  %v1821_v28 = vpop.f32.mrb[12].mxu1  ;;  %v396_v29 = vadd.f32 %v1805_v27, %v2162_v49  ;;  %v387_v31 = vpop.f32.mrb[13].mxu0  ;;  %v2262_v5 = vshrl.u32 (!%p1636_p4), %v539_v4, 7 }
  0xf8   : > { %v460_v30 = vadd.f32 %v1821_v28, %v2162_v49  ;;  %v451_v32 = vpop.f32.mrb[13].mxu1  ;;  %v388_v33 = vadd.f32 %v2162_v49, %v387_v31  ;;  %v1806_v35 = vpop.f32.mrb[14].mxu0 }
  0xf9   : > { %v452_v34 = vadd.f32 %v2162_v49, %v451_v32  ;;  %v1822_v36 = vpop.f32.mrb[14].mxu1  ;;  %v480_v37 = vmul.f32 0.33, %v396_v29  ;;  %v399_v41 = vadd.f32 %v1806_v35, %v2162_v49  ;;  %v390_v45 = vpop.f32.mrb[15].mxu0  ;;  %533 = sbr.rel (%p1636_p4) target bundleno = 343 (0x157), region = 36  ;;  %v541_v8 = vadd.s32 (!%p1636_p4), 8, %v2262_v5 }
  0xfa   : > { %v496_v40 = vmul.f32 0.33, %v460_v30  ;;  %v463_v44 = vadd.f32 %v1822_v36, %v2162_v49  ;;  %v454_v51 = vpop.f32.mrb[15].mxu1  ;;  %v478_v52 = vmul.f32 0.33, %v388_v33  ;;  %v391_v54 = vadd.f32 %v2162_v49, %v390_v45 }
  0xfb   : > { %v494_v53 = vmul.f32 0.33, %v452_v34  ;;  %v455_v55 = vadd.f32 %v2162_v49, %v454_v51  ;;  %v2244_v56 = vmax.f32 %v396_v29, %v480_v37  ;;  %v481_v58 = vmul.f32 0.33, %v399_v41 }
  0xfc   : > { %v2246_v57 = vmax.f32 %v460_v30, %v496_v40  ;;  %v497_v59 = vmul.f32 0.33, %v463_v44  ;;  %v2248_v60 = vmax.f32 %v388_v33, %v478_v52  ;;  %v479_v62 = vmul.f32 0.33, %v391_v54 }
  0xfd   : > { %v2250_v61 = vmax.f32 %v452_v34, %v494_v53  ;;  %v495_v63 = vmul.f32 0.33, %v455_v55  ;;  %v2252_v0 = vmax.f32 %v399_v41, %v481_v58  ;;  %v1993_v49 = vmov (!%p1636_p4), 0.0  }
  0xfe   : > { %v2254_v1 = vmax.f32 %v463_v44, %v497_v59  ;;  %v2256_v2 = vmax.f32 %v391_v54, %v479_v62  ;;  %538 = vst [vmem:[#allocation2] sm:$0x3] (!%p1636_p4), %v1993_v49  ;;  %v542_v18 = vadd.s32 (!%p1636_p4), 16, %v2262_v5  ;;  %v543_v21 = vadd.s32 (!%p1636_p4), 24, %v2262_v5 }
  0xff   : > { %v2258_v3 = vmax.f32 %v455_v55, %v495_v63  ;;  %vm607_vm1 = vcmp.lt.s32.totalorder (!%p1636_p4), %v2262_v5, %v2266_v13  ;;  %vm608_vm2 = vcmp.lt.s32.totalorder (!%p1636_p4), %v541_v8, %v2266_v13  ;;  %v544_v22 = vadd.s32 (!%p1636_p4), 32, %v2262_v5 }
 0x100   : > { %vm609_vm3 = vcmp.lt.s32.totalorder %v542_v18, %v2266_v13  ;;  %v1637_v27 = vsel %vm607_vm1, 1.0, %v1993_v49  ;;  %v1638_v28 = vsel %vm608_vm2, 1.0, %v1993_v49  ;;  %v545_v29 = vadd.s32 40, %v2262_v5 }
 0x101   : > { %vm610_vm4 = vcmp.lt.s32.totalorder %v543_v21, %v2266_v13  ;;  %v1639_v30 = vsel %vm609_vm3, 1.0, %v1993_v49  ;;  %v546_v31 = vadd.s32 48, %v2262_v5  ;;  %vm611_vm5 = vcmp.lt.s32.totalorder %v544_v22, %v2266_v13 }
 0x102   : > { %v703_v32 = vmul.f32 %v1637_v27, %v2176_v10  ;;  %v704_v33 = vmul.f32 %v1638_v28, %v2184_v16  ;;  %v1640_v34 = vsel %vm610_vm4, 1.0, %v1993_v49  ;;  %v547_v35 = vadd.s32 56, %v2262_v5 }
 0x103   : > { %vm612_vm6 = vcmp.lt.s32.totalorder %v545_v29, %v2266_v13  ;;  %v705_v36 = vmul.f32 %v1639_v30, %v2172_v6  ;;  %v548_v40 = vadd.s32 64, %v2262_v5  ;;  %v1641_v41 = vsel %vm611_vm5, 1.0, %v1993_v49 }
 0x104   : > { %v736_v37 = vadd.f32 %v704_v33, %v703_v32  ;;  %vm613_vm7 = vcmp.lt.s32.totalorder %v546_v31, %v2266_v13  ;;  %v706_v44 = vmul.f32 %v1640_v34, %v2180_v14  ;;  %v1642_v51 = vsel %vm612_vm6, 1.0, %v1993_v49 }
 0x105   : > { %v549_v52 = vadd.s32 72, %v2262_v5  ;;  %vm614_vm8 = vcmp.lt.s32.totalorder %v547_v35, %v2266_v13  ;;  %v707_v53 = vmul.f32 %v1641_v41, %v2200_v42  ;;  %v550_v55 = vadd.s32 80, %v2262_v5 }
 0x106   : > { %v737_v45 = vadd.f32 %v736_v37, %v705_v36  ;;  %vm615_vm9 = vcmp.lt.s32.totalorder %v548_v40, %v2266_v13  ;;  %v1643_v58 = vsel %vm613_vm7, 1.0, %v1993_v49  ;;  %v708_v59 = vmul.f32 %v1642_v51, %v2208_v48 }
 0x107   : > { %v776_v63 = vmul.f32 %v703_v32, %v2176_v10  ;;  %v777_v4 = vmul.f32 %v704_v33, %v2184_v16  ;;  %v551_v8 = vadd.s32 88, %v2262_v5  ;;  %v1644_v18 = vsel %vm614_vm8, 1.0, %v1993_v49 }
 0x108   : > { %v738_v54 = vadd.f32 %v737_v45, %v706_v44  ;;  %vm616_vm10 = vcmp.lt.s32.totalorder %v549_v52, %v2266_v13  ;;  %v709_v21 = vmul.f32 %v1643_v58, %v2196_v38  ;;  %v778_v27 = vmul.f32 %v705_v36, %v2172_v6 }
 0x109   : > { %v552_v28 = vadd.s32 96, %v2262_v5  ;;  %vm617_vm11 = vcmp.lt.s32.totalorder %v550_v55, %v2266_v13  ;;  %v1645_v29 = vsel %vm615_vm9, 1.0, %v1993_v49  ;;  %v710_v30 = vmul.f32 %v1644_v18, %v2204_v46 }
 0x10a   : > { %v739_v62 = vadd.f32 %v738_v54, %v707_v53  ;;  %v779_v32 = vmul.f32 %v706_v44, %v2180_v14  ;;  %v808_v33 = vadd.f32 %v777_v4, %v776_v63  ;;  %v553_v34 = vadd.s32 104, %v2262_v5 }
 0x10b   : > { %vm618_vm12 = vcmp.lt.s32.totalorder %v551_v8, %v2266_v13  ;;  %v1646_v35 = vsel %vm616_vm10, 1.0, %v1993_v49  ;;  %v711_v36 = vmul.f32 %v1645_v29, %v2224_v19  ;;  %v780_v40 = vmul.f32 %v707_v53, %v2200_v42 }
 0x10c   : > { %v740_v22 = vadd.f32 %v739_v62, %v708_v59  ;;  %v809_v41 = vadd.f32 %v808_v33, %v778_v27  ;;  %v554_v45 = vadd.s32 112, %v2262_v5  ;;  %vm619_vm13 = vcmp.lt.s32.totalorder %v552_v28, %v2266_v13 }
 0x10d   : > { %v1647_v51 = vsel %vm617_vm11, 1.0, %v1993_v49  ;;  %v712_v44 = vmul.f32 %v1646_v35, %v2232_v25  ;;  %v781_v54 = vmul.f32 %v708_v59, %v2208_v48  ;;  %v555_v58 = vadd.s32 120, %v2262_v5 }
 0x10e   : > { %v741_v31 = vadd.f32 %v740_v22, %v709_v21  ;;  %v810_v55 = vadd.f32 %v809_v41, %v779_v32  ;;  %vm620_vm14 = vcmp.lt.s32.totalorder %v553_v34, %v2266_v13  ;;  %v1648_v62 = vsel %vm618_vm12, 1.0, %v1993_v49 }
 0x10f   : > { %v713_v53 = vmul.f32 %v1647_v51, %v2220_v9  ;;  %v782_v4 = vmul.f32 %v709_v21, %v2196_v38  ;;  %v556_v18 = vadd.s32 128, %v2262_v5  ;;  %vm621_vm15 = vcmp.lt.s32.totalorder %v554_v45, %v2266_v13 }
 0x110   : > { %v742_v37 = vadd.f32 %v741_v31, %v710_v30  ;;  %v811_v8 = vadd.f32 %v810_v55, %v780_v40  ;;  %v1649_v22 = vsel %vm619_vm13, 1.0, %v1993_v49  ;;  %v714_v59 = vmul.f32 %v1648_v62, %v2228_v23 }
 0x111   : > { %v783_v28 = vmul.f32 %v710_v30, %v2204_v46  ;;  %v557_v31 = vadd.s32 136, %v2262_v5  ;;  %vm622_vm0 = vcmp.lt.s32.totalorder %v555_v58, %v2266_v13  ;;  %v1650_v32 = vsel %vm620_vm14, 1.0, %v1993_v49 }
 0x112   : > { %v743_v52 = vadd.f32 %v742_v37, %v711_v36  ;;  %v812_v29 = vadd.f32 %v811_v8, %v781_v54  ;;  %v715_v21 = vmul.f32 %v1649_v22, %v2248_v60  ;;  %v784_v34 = vmul.f32 %v711_v36, %v2224_v19 }
 0x113   : > { %v558_v37 = vadd.s32 144, %v2262_v5  ;;  %vm623_vm1 = vcmp.lt.s32.totalorder %v556_v18, %v2266_v13  ;;  %v1651_v40 = vsel %vm621_vm15, 1.0, %v1993_v49  ;;  %v716_v30 = vmul.f32 %v1650_v32, %v2256_v2 }
 0x114   : > { %v744_v63 = vadd.f32 %v743_v52, %v712_v44  ;;  %v813_v35 = vadd.f32 %v812_v29, %v782_v4  ;;  %v785_v45 = vmul.f32 %v712_v44, %v2232_v25  ;;  %v559_v52 = vadd.s32 152, %v2262_v5 }
 0x115   : > { %vm624_vm2 = vcmp.lt.s32.totalorder %v557_v31, %v2266_v13  ;;  %v1652_v54 = vsel %vm622_vm0, 1.0, %v1993_v49  ;;  %v717_v36 = vmul.f32 %v1651_v40, %v2244_v56  ;;  %v786_v58 = vmul.f32 %v713_v53, %v2220_v9 }
 0x116   : > { %v745_v27 = vadd.f32 %v744_v63, %v713_v53  ;;  %v814_v51 = vadd.f32 %v813_v35, %v783_v28  ;;  %v560_v63 = vadd.s32 160, %v2262_v5  ;;  %vm625_vm3 = vcmp.lt.s32.totalorder %v558_v37, %v2266_v13 }
 0x117   : > { %v1653_v4 = vsel %vm623_vm1, 1.0, %v1993_v49  ;;  %v718_v44 = vmul.f32 %v1652_v54, %v2252_v0  ;;  %v787_v18 = vmul.f32 %v714_v59, %v2228_v23  ;;  %vm626_vm4 = vcmp.lt.s32.totalorder %v559_v52, %v2266_v13 }
 0x118   : > { %v746_v33 = vadd.f32 %v745_v27, %v714_v59  ;;  %v815_v62 = vadd.f32 %v814_v51, %v784_v34  ;;  %v561_v27 = vadd.s32 168, %v2262_v5  ;;  %v1654_v28 = vsel %vm624_vm2, 1.0, %v1993_v49 }
 0x119   : > { %v719_v53 = vmul.f32 %v1653_v4, %v2178_v11  ;;  %v788_v31 = vmul.f32 %v715_v21, %v2248_v60  ;;  %vm627_vm5 = vcmp.lt.s32.totalorder %v560_v63, %v2266_v13  ;;  %v1655_v34 = vsel %vm625_vm3, 1.0, %v1993_v49 }
 0x11a   : > { %v747_v41 = vadd.f32 %v746_v33, %v715_v21  ;;  %v816_v22 = vadd.f32 %v815_v62, %v785_v45  ;;  %v562_v33 = vadd.s32 176, %v2262_v5  ;;  %v720_v59 = vmul.f32 %v1654_v28, %v2186_v17 }
 0x11b   : > { %v789_v37 = vmul.f32 %v716_v30, %v2256_v2  ;;  %vm628_vm6 = vcmp.lt.s32.totalorder %v561_v27, %v2266_v13  ;;  %v1656_v45 = vsel %vm626_vm4, 1.0, %v1993_v49  ;;  %v721_v21 = vmul.f32 %v1655_v34, %v2174_v7 }
 0x11c   : > { %v748_v55 = vadd.f32 %v747_v41, %v716_v30  ;;  %v817_v32 = vadd.f32 %v816_v22, %v786_v58  ;;  %v563_v41 = vadd.s32 184, %v2262_v5  ;;  %v790_v52 = vmul.f32 %v717_v36, %v2244_v56 }
 0x11d   : > { %vm629_vm7 = vcmp.lt.s32.totalorder %v562_v33, %v2266_v13  ;;  %v1657_v58 = vsel %vm627_vm5, 1.0, %v1993_v49  ;;  %v722_v30 = vmul.f32 %v1656_v45, %v2182_v15  ;;  %v791_v63 = vmul.f32 %v718_v44, %v2252_v0 }
 0x11e   : > { %v749_v8 = vadd.f32 %v748_v55, %v717_v36  ;;  %v818_v40 = vadd.f32 %v817_v32, %v787_v18  ;;  %v564_v55 = vadd.s32 192, %v2262_v5  ;;  %vm630_vm8 = vcmp.lt.s32.totalorder %v563_v41, %v2266_v13 }
 0x11f   : > { %v1658_v18 = vsel %vm628_vm6, 1.0, %v1993_v49  ;;  %v723_v36 = vmul.f32 %v1657_v58, %v2202_v43  ;;  %v792_v27 = vmul.f32 %v719_v53, %v2178_v11  ;;  %v793_v33 = vmul.f32 %v720_v59, %v2186_v17 }
 0x120   : > { %v750_v29 = vadd.f32 %v749_v8, %v718_v44  ;;  %v819_v54 = vadd.f32 %v818_v40, %v788_v31  ;;  %v565_v8 = vadd.s32 200, %v2262_v5  ;;  %vm631_vm9 = vcmp.lt.s32.totalorder %v564_v55, %v2266_v13 }
 0x121   : > { %v1659_v31 = vsel %vm629_vm7, 1.0, %v1993_v49  ;;  %v724_v44 = vmul.f32 %v1658_v18, %v2210_v50  ;;  %v794_v41 = vmul.f32 %v721_v21, %v2174_v7  ;;  %v795_v55 = vmul.f32 %v722_v30, %v2182_v15 }
 0x122   : > { %v751_v35 = vadd.f32 %v750_v29, %v719_v53  ;;  %v820_v4 = vadd.f32 %v819_v54, %v789_v37  ;;  %v566_v29 = vadd.s32 208, %v2262_v5  ;;  %vm632_vm10 = vcmp.lt.s32.totalorder %v565_v8, %v2266_v13 }
 0x123   : > { %v1660_v37 = vsel %vm630_vm8, 1.0, %v1993_v49  ;;  %v725_v53 = vmul.f32 %v1659_v31, %v2198_v39  ;;  %v796_v8 = vmul.f32 %v723_v36, %v2202_v43 }
 0x124   : > { %v752_v51 = vadd.f32 %v751_v35, %v720_v59  ;;  %v821_v28 = vadd.f32 %v820_v4, %v790_v52  ;;  %v567_v35 = vadd.s32 216, %v2262_v5  ;;  %vm633_vm11 = vcmp.lt.s32.totalorder %v566_v29, %v2266_v13 }
 0x125   : > { %v1661_v52 = vsel %vm631_vm9, 1.0, %v1993_v49  ;;  %v726_v59 = vmul.f32 %v1660_v37, %v2206_v47  ;;  %v797_v29 = vmul.f32 %v724_v44, %v2210_v50 }
 0x126   : > { %v753_v62 = vadd.f32 %v752_v51, %v721_v21  ;;  %v822_v34 = vadd.f32 %v821_v28, %v791_v63  ;;  %v568_v51 = vadd.s32 224, %v2262_v5  ;;  %vm634_vm12 = vcmp.lt.s32.totalorder %v567_v35, %v2266_v13 }
 0x127   : > { %v1662_v63 = vsel %vm632_vm10, 1.0, %v1993_v49  ;;  %v727_v21 = vmul.f32 %v1661_v52, %v2226_v20  ;;  %v798_v35 = vmul.f32 %v725_v53, %v2198_v39 }
 0x128   : > { %v754_v22 = vadd.f32 %v753_v62, %v722_v30  ;;  %v823_v45 = vadd.f32 %v822_v34, %v792_v27  ;;  %v569_v62 = vadd.s32 232, %v2262_v5  ;;  %vm635_vm13 = vcmp.lt.s32.totalorder %v568_v51, %v2266_v13 }
 0x129   : > { %v1663_v27 = vsel %vm633_vm11, 1.0, %v1993_v49  ;;  %v728_v30 = vmul.f32 %v1662_v63, %v2234_v26 }
 0x12a   : > { %v755_v32 = vadd.f32 %v754_v22, %v723_v36  ;;  %v824_v58 = vadd.f32 %v823_v45, %v793_v33  ;;  %v570_v22 = vadd.s32 240, %v2262_v5  ;;  %vm636_vm14 = vcmp.lt.s32.totalorder %v569_v62, %v2266_v13 }
 0x12b   : > { %v1664_v33 = vsel %vm634_vm12, 1.0, %v1993_v49  ;;  %v729_v36 = vmul.f32 %v1663_v27, %v2222_v12  ;;  %v799_v45 = vmul.f32 %v726_v59, %v2206_v47  ;;  %v1666_v51 = vsel %vm636_vm14, 1.0, %v1993_v49 }
 0x12c   : > { %v756_v40 = vadd.f32 %v755_v32, %v724_v44  ;;  %v825_v18 = vadd.f32 %v824_v58, %v794_v41  ;;  %v571_v32 = vadd.s32 248, %v2262_v5  ;;  %vm637_vm15 = vcmp.lt.s32.totalorder %v570_v22, %v2266_v13 }
 0x12d   : > { %v730_v41 = vmul.f32 %v1664_v33, %v2230_v24  ;;  %v1667_v58 = vsel %vm637_vm15, 1.0, %v1993_v49  ;;  %v732_v62 = vmul.f32 %v1666_v51, %v2258_v3  ;;  %v802_v22 = vmul.f32 %v729_v36, %v2222_v12 }
 0x12e   : > { %v757_v54 = vadd.f32 %v756_v40, %v725_v53  ;;  %v826_v31 = vadd.f32 %v825_v18, %v795_v55  ;;  %v1665_v40 = vsel %vm635_vm13, 1.0, %v1993_v49  ;;  %vm638_vm0 = vcmp.lt.s32.totalorder %v571_v32, %v2266_v13 }
 0x12f   : > { %v731_v52 = vmul.f32 %v1665_v40, %v2250_v61  ;;  %v800_v53 = vmul.f32 %v727_v21, %v2226_v20  ;;  %v733_v13 = vmul.f32 %v1667_v58, %v2246_v57 }
 0x130   : > { %v758_v4 = vadd.f32 %v757_v54, %v726_v59  ;;  %v827_v37 = vadd.f32 %v826_v31, %v796_v8  ;;  %v1668_v59 = vsel %vm638_vm0, 1.0, %v1993_v49 }
 0x131   : > { %v804_v33 = vmul.f32 %v731_v52, %v2250_v61  ;;  %v806_v40 = vmul.f32 %v733_v13, %v2246_v57 }
 0x132   : > { %v759_v28 = vadd.f32 %v758_v4, %v727_v21  ;;  %v828_v5 = vadd.f32 %v827_v37, %v797_v29  ;;  %v801_v4 = vmul.f32 %v728_v30, %v2234_v26  ;;  %v803_v29 = vmul.f32 %v730_v41, %v2230_v24 }
 0x134   : > { %v760_v34 = vadd.f32 %v759_v28, %v728_v30  ;;  %v829_v55 = vadd.f32 %v828_v5, %v798_v35  ;;  %v734_v28 = vmul.f32 %v1668_v59, %v2254_v1  ;;  %v805_v35 = vmul.f32 %v732_v62, %v2258_v3 }
 0x136   : > { %v761_v44 = vadd.f32 %v760_v34, %v729_v36  ;;  %v830_v8 = vadd.f32 %v829_v55, %v799_v45  ;;  %v807_v45 = vmul.f32 %v734_v28, %v2254_v1  ;;  %v735_v55 = vld [vmem:[#allocation2] sm:$0x1] }
 0x138   : > { %v762_v54 = vadd.f32 %v761_v44, %v730_v41  ;;  %v831_v27 = vadd.f32 %v830_v8, %v800_v53 }
 0x13a   : > { %v763_v63 = vadd.f32 %v762_v54, %v731_v52  ;;  %v832_v31 = vadd.f32 %v831_v27, %v801_v4 }
 0x13c   : > { %v764_v18 = vadd.f32 %v763_v63, %v732_v62  ;;  %v833_v34 = vadd.f32 %v832_v31, %v802_v22 }
 0x13e   : > { %v765_v21 = vadd.f32 %v764_v18, %v733_v13  ;;  %v834_v49 = vadd.f32 %v833_v34, %v803_v29  ;;  %v775_v18 = vld [vmem:[#allocation2 + $0x1] sm:$0x1] }
 0x140   : > { %v766_v32 = vadd.f32 %v765_v21, %v734_v28  ;;  %v835_v44 = vadd.f32 %v834_v49, %v804_v33 }
 0x142   : > { %v767_v30 = vrot.slane %v766_v32, 4  ;;  %v836_v5 = vadd.f32 %v835_v44, %v805_v35 }
 0x144   : > { %v768_v37 = vadd.f32 %v767_v30, %v766_v32  ;;  %v837_v54 = vadd.f32 %v836_v5, %v806_v40 }
 0x146   : > { %v769_v36 = vrot.slane %v768_v37, 2  ;;  %v838_v53 = vadd.f32 %v837_v54, %v807_v45 }
 0x148   : > { %v770_v51 = vadd.f32 %v769_v36, %v768_v37  ;;  %v839_v52 = vrot.slane %v838_v53, 4 }
 0x14a   : > { %v771_v41 = vrot.slane %v770_v51, 1  ;;  %v840_v4 = vadd.f32 %v839_v52, %v838_v53 }
 0x14c   : > { %v772_v58 = vadd.f32 %v771_v41, %v770_v51  ;;  %v841_v62 = vrot.slane %v840_v4, 2 }
 0x14e   : > { %v773_v63 = vadd.f32 %v772_v58, %v735_v55  ;;  %v842_v8 = vadd.f32 %v841_v62, %v840_v4 }
 0x150   : > { %774 = vst [vmem:[#allocation2] sm:$0x1] %v773_v63  ;;  %v843_v59 = vrot.slane %v842_v8, 1 }
 0x152   : > { %v844_v13 = vadd.f32 %v843_v59, %v842_v8 }
 0x154   : > { %v845_v22 = vadd.f32 %v844_v13, %v775_v18 }
 0x156   : > { %846 = vst [vmem:[#allocation2 + $0x1] sm:$0x1] %v845_v22 }
 0x157 PF: > { %p1669_p5 = scmp.ne.s32.totalorder %s1983_s17, 1 }
 0x158   : > { %s851_s23 = scvt.s32.f32 (!%p1669_p5), %s2042_s20  ;;  %v1949_v27 = vld [vmem:[%s2797_s2 + $0x40] sm:$0xff] (!%p1669_p5)   ;;  %v1950_v21 = vld [vmem:[%s2797_s2 + $0x48] sm:$0xff] (!%p1669_p5)   ;;  %v1951_v29 = vld [vmem:[%s2797_s2 + $0x50] sm:$0xff] (!%p1669_p5)   ;;  %p870_p6 = scmp.gt.s32.totalorder (!%p1669_p5), %s2042_s20, 1  ;;  %v879_v63 = vlaneseq (!%p1669_p5)  ;;  %vm1509_vm1 = vcmask (!%p1669_p5), 7168  }
 0x159   : > { %850 = sbr.rel (%p1669_p5) target bundleno = 943 (0x3af), region = 44  ;;  %1823 = vmatprep.subr.bf16.mxu0 (!%p1669_p5), %v1949_v27  ;;  %v1952_v31 = vld [vmem:[%s2797_s2 + $0x58] sm:$0xff] (!%p1669_p5)   ;;  %v1953_v32 = vld [vmem:[%s2797_s2 + $0x60] sm:$0xff] (!%p1669_p5)   ;;  %v1954_v34 = vld [vmem:[%s2797_s2 + $0x68] sm:$0xff] (!%p1669_p5)  }
 0x15a   : > { %v852_v28 = vstv (!%p1669_p5), %s851_s23  ;;  %1824 = vmatpush3.bf16.msra.mxu0 (!%p1669_p5), %v1949_v27  ;;  %v1955_v30 = vld [vmem:[%s2797_s2 + $0x70] sm:$0xff] (!%p1669_p5)   ;;  %v1956_v35 = vld [vmem:[%s2797_s2 + $0x78] sm:$0xff] (!%p1669_p5)   ;;  %v1957_v49 = vld [vmem:[%s2797_s2 + $0x80] sm:$0xff] (!%p1669_p5)   ;;  %v880_v62 = vshrl.u32 (!%p1669_p5), %v879_v63, 7 }
 0x15b   : > { %1965 = vrcp.f32 (!%p1669_p5), %v852_v28  ;;  %1825 = vmatprep.subr.bf16.mxu0 (!%p1669_p5), %v1950_v21  ;;  %v1958_v37 = vld [vmem:[%s2797_s2 + $0x88] sm:$0xff] (!%p1669_p5)   ;;  %1871 = vmatprep.subr.bf16.mxu1 (!%p1669_p5), %v1957_v49  ;;  %v1959_v40 = vld [vmem:[%s2797_s2 + $0x90] sm:$0xff] (!%p1669_p5)   ;;  %v1960_v44 = vld [vmem:[%s2797_s2 + $0x98] sm:$0xff] (!%p1669_p5)  }
 0x15c   : > { %1872 = vmatpush3.bf16.msra.mxu1 (!%p1669_p5), %v1957_v49  ;;  %v1961_v36 = vld [vmem:[%s2797_s2 + $0xa0] sm:$0xff] (!%p1669_p5)  }
 0x15d   : > { %1873 = vmatprep.subr.bf16.mxu1 (!%p1669_p5), %v1958_v37  ;;  %v855_v45 = vld [vmem:[#allocation2] sm:$0x1] (!%p1669_p5)  ;;  %v858_v51 = vld [vmem:[#allocation2 + $0x1] sm:$0x1] (!%p1669_p5)  ;;  %v863_v4 = vld [vmem:[%s2798_s3 + $0x3] sm:$0x1] (!%p1669_p5) }
 0x15e   : > { %1826 = vmatpush3.bf16.msra.mxu0 (!%p1669_p5), %v1950_v21  ;;  %v864_v13 = vld [vmem:[%s2798_s3 + $0x4] sm:$0x1] (!%p1669_p5)  ;;  %v881_v21 = vsub.s32 (!%p1669_p5), 0, %v880_v62 }
 0x15f   : > { %1827 = vmatprep.subr.bf16.mxu0 (!%p1669_p5), %v1951_v29 }
 0x160   : > { %1874 = vmatpush3.bf16.msra.mxu1 %v1958_v37  ;;  %s871_s28 = scalar_select %p870_p6, 1, 0 }
 0x161   : > { %1875 = vmatprep.subr.bf16.mxu1 %v1959_v40 }
 0x162   : > { %1828 = vmatpush3.bf16.msra.mxu0 %v1951_v29  ;;  %s872_s29 = scvt.s32.f32 %s871_s28 }
 0x163   : > { %1829 = vmatprep.subr.bf16.mxu0 %v1952_v31 }
 0x164   : > { %1876 = vmatpush3.bf16.msra.mxu1 %v1959_v40  ;;  %s875_s5 = ssub.f32 1.0, %s872_s29  ;;  %v873_v59 = vstv %s872_s29 }
 0x165   : > { %v1966_v33 = vpop.eup %1965  ;;  %1877 = vmatprep.subr.bf16.mxu1 %v1960_v44 }
 0x166   : > { %1921 = vpush %v1966_v33  ;;  %1830 = vmatpush3.bf16.msra.mxu0 %v1952_v31  ;;  %v876_v22 = vstv %s875_s5 }
 0x167   : > { %1831 = vmatprep.subr.bf16.mxu0 %v1953_v32 }
 0x168   : > { %1878 = vmatpush3.bf16.msra.mxu1 %v1960_v44 }
 0x169   : > { %1879 = vmatprep.subr.bf16.mxu1 %v1961_v36 }
 0x16a   : > { %1832 = vmatpush3.bf16.msra.mxu0 %v1953_v32 }
 0x16b   : > { %1833 = vmatprep.subr.bf16.mxu0 %v1954_v34 }
 0x16c   : > { %1880 = vmatpush3.bf16.msra.mxu1 %v1961_v36 }
 0x16e   : > { %1834 = vmatpush3.bf16.msra.mxu0 %v1954_v34 }
 0x16f   : > { %1835 = vmatprep.subr.bf16.mxu0 %v1955_v30 }
 0x172   : > { %1836 = vmatpush3.bf16.msra.mxu0 %v1955_v30 }
 0x173   : > { %1837 = vmatprep.subr.bf16.mxu0 %v1956_v35 }
 0x176   : > { %1838 = vmatpush3.bf16.msra.mxu0 %v1956_v35 }
 0x197   : > { %s1922_s27 = spop %1921 }
 0x198   : > { %v856_v5 = vstv %s1922_s27 }
 0x199   : > { %v857_v54 = vmul.f32 %v856_v5, %v855_v45  ;;  %v859_v41 = vmul.f32 %v858_v51, %v856_v5 }
 0x19b   : > { %v860_v53 = vmul.f32 %v857_v54, %v857_v54 }
 0x19d   : > { %v861_v55 = vsub.f32 %v859_v41, %v860_v53 }
 0x19f   : > { %v862_v58 = vmax.f32 %v861_v55, 0.0 }
 0x1a1   : > { %v865_v52 = vadd.f32 1e-05, %v862_v58 }
 0x1a3   : > { %1967 = vrsqrt.f32 %v865_v52 }
 0x1ad   : > { %v1968_v8 = vpop.eup %1967 }
 0x1ae   : > { %v867_v18 = vmul.f32 %v1968_v8, %v863_v4 }
 0x1b0   : > { %v868_v27 = vmul.f32 %v867_v18, %v857_v54  ;;  %v874_v28 = vmul.f32 %v873_v59, %v867_v18 }
 0x1b2   : > { %v869_v29 = vsub.f32 %v864_v13, %v868_v27  ;;  %v877_v31 = vadd.f32 %v876_v22, %v874_v28 }
 0x1b4   : > { %v878_v32 = vmul.f32 %v873_v59, %v869_v29  ;;  %v2475_v33 = vrot.slane %v877_v31, %v881_v21 }
 0x1b6   : > { %v2477_v34 = vrot.slane %v878_v32, %v881_v21  ;;  %v883_v30 = vmul.f32 %v2475_v33, %v2176_v10  ;;  %v884_v35 = vmul.f32 %v2475_v33, %v2184_v16  ;;  %v885_v49 = vmul.f32 %v2475_v33, %v2172_v6 }
 0x1b7   : > { %v886_v37 = vmul.f32 %v2475_v33, %v2180_v14  ;;  %v887_v40 = vmul.f32 %v2475_v33, %v2200_v42  ;;  %v888_v44 = vmul.f32 %v2475_v33, %v2208_v48  ;;  %v889_v42 = vmul.f32 %v2475_v33, %v2196_v38 }
 0x1b8   : > { %v919_v36 = vadd.f32 %v2477_v34, %v883_v30  ;;  %v920_v45 = vadd.f32 %v2477_v34, %v884_v35  ;;  %v921_v10 = vadd.f32 %v2477_v34, %v885_v49  ;;  %v890_v48 = vmul.f32 %v2475_v33, %v2204_v46 }
 0x1b9   : > { %v922_v16 = vadd.f32 %v2477_v34, %v886_v37  ;;  %v923_v5 = vadd.f32 %v2477_v34, %v887_v40  ;;  %v924_v6 = vadd.f32 %v2477_v34, %v888_v44  ;;  %v891_v41 = vmul.f32 %v2475_v33, %v2224_v19 }
 0x1ba   : > { %v951_v51 = vpack.c.bf16 %v920_v45, %v919_v36  ;;  %v892_v53 = vmul.f32 %v2475_v33, %v2232_v25  ;;  %v925_v55 = vadd.f32 %v2477_v34, %v889_v42  ;;  %v926_v58 = vadd.f32 %v2477_v34, %v890_v48 }
 0x1bb   : > { %v952_v14 = vpack.c.bf16 %v922_v16, %v921_v10  ;;  %v953_v54 = vpack.c.bf16 %v924_v6, %v923_v5  ;;  %v927_v52 = vadd.f32 %v2477_v34, %v891_v41  ;;  %v893_v46 = vmul.f32 %v2475_v33, %v2220_v9 }
 0x1bc   : > { %1839 = vmatprep.mubr.bf16.mxu0 %v951_v51  ;;  %v928_v38 = vadd.f32 %v2477_v34, %v892_v53  ;;  %v954_v63 = vpack.c.bf16 %v926_v58, %v925_v55  ;;  %v894_v19 = vmul.f32 %v2475_v33, %v2228_v23  ;;  %v895_v25 = vmul.f32 %v2475_v33, %v2248_v60  ;;  %v1962_v58 = vld [vmem:[%s2797_s2 + $0xa8] sm:$0xff]  }
 0x1bd   : > { %1840 = vmatmul.mubr.bf16.vlgmr.msra.gmra.mrb[0].mxu0 %v952_v14  ;;  %v896_v62 = vmul.f32 %v2475_v33, %v2256_v2  ;;  %v929_v8 = vadd.f32 %v2477_v34, %v893_v46  ;;  %v897_v23 = vmul.f32 %v2475_v33, %v2244_v56  ;;  %v898_v60 = vmul.f32 %v2475_v33, %v2252_v0 }
 0x1be   : > { %1843 = vmatprep.mubr.bf16.mxu0 %v953_v54  ;;  %v955_v4 = vpack.c.bf16 %v928_v38, %v927_v52  ;;  %v930_v59 = vadd.f32 %v2477_v34, %v894_v19  ;;  %v931_v18 = vadd.f32 %v2477_v34, %v895_v25  ;;  %v899_v2 = vmul.f32 %v2475_v33, %v2178_v11 }
 0x1bf   : > { %v932_v9 = vadd.f32 %v2477_v34, %v896_v62  ;;  %v900_v27 = vmul.f32 %v2475_v33, %v2186_v17  ;;  %v933_v28 = vadd.f32 %v2477_v34, %v897_v23  ;;  %v934_v21 = vadd.f32 %v2477_v34, %v898_v60  ;;  %1881 = vmatprep.subr.bf16.mxu1 %v1962_v58 }
 0x1c0   : > { %v956_v13 = vpack.c.bf16 %v930_v59, %v929_v8  ;;  %v935_v29 = vadd.f32 %v2477_v34, %v899_v2  ;;  %v901_v0 = vmul.f32 %v2475_v33, %v2174_v7  ;;  %v902_v11 = vmul.f32 %v2475_v33, %v2182_v15  ;;  %1882 = vmatpush3.bf16.msra.mxu1 %v1962_v58 }
 0x1c1   : > { %v957_v22 = vpack.c.bf16 %v932_v9, %v931_v18  ;;  %v936_v56 = vadd.f32 %v2477_v34, %v900_v27  ;;  %v958_v31 = vpack.c.bf16 %v934_v21, %v933_v28  ;;  %v903_v17 = vmul.f32 %v2475_v33, %v2202_v43 }
 0x1c2   : > { %v904_v30 = vmul.f32 %v2475_v33, %v2210_v50  ;;  %v937_v35 = vadd.f32 %v2477_v34, %v901_v0  ;;  %v938_v49 = vadd.f32 %v2477_v34, %v902_v11  ;;  %v905_v15 = vmul.f32 %v2475_v33, %v2198_v39 }
 0x1c3   : > { %v959_v32 = vpack.c.bf16 %v936_v56, %v935_v29  ;;  %v939_v37 = vadd.f32 %v2477_v34, %v903_v17  ;;  %v906_v43 = vmul.f32 %v2475_v33, %v2206_v47  ;;  %v907_v50 = vmul.f32 %v2475_v33, %v2226_v20 }
 0x1c4   : > { %v940_v7 = vadd.f32 %v2477_v34, %v904_v30  ;;  %v960_v40 = vpack.c.bf16 %v938_v49, %v937_v35  ;;  %v908_v36 = vmul.f32 %v2475_v33, %v2234_v26  ;;  %v941_v45 = vadd.f32 %v2477_v34, %v905_v15 }
 0x1c5   : > { %1844 = vmatmul.mubr.bf16.gmra.mrb[4].mxu0 %v954_v63  ;;  %v942_v10 = vadd.f32 %v2477_v34, %v906_v43  ;;  %v943_v16 = vadd.f32 %v2477_v34, %v907_v50  ;;  %v909_v47 = vmul.f32 %v2475_v33, %v2222_v12  ;;  %v910_v20 = vmul.f32 %v2475_v33, %v2230_v24 }
 0x1c6   : > { %1847 = vmatprep.mubr.bf16.mxu0 %v955_v4  ;;  %v961_v44 = vpack.c.bf16 %v940_v7, %v939_v37  ;;  %v944_v39 = vadd.f32 %v2477_v34, %v908_v36  ;;  %v911_v26 = vmul.f32 %v2475_v33, %v2250_v61  ;;  %v912_v51 = vmul.f32 %v2475_v33, %v2258_v3 }
 0x1c7   : > { %v962_v5 = vpack.c.bf16 %v942_v10, %v941_v45  ;;  %v945_v14 = vadd.f32 %v2477_v34, %v909_v47  ;;  %v946_v42 = vadd.f32 %v2477_v34, %v910_v20  ;;  %v913_v24 = vmul.f32 %v2475_v33, %v2246_v57  ;;  %v1963_v57 = vld [vmem:[%s2797_s2 + $0xb0] sm:$0xff]  }
 0x1c8   : > { %v963_v6 = vpack.c.bf16 %v944_v39, %v943_v16  ;;  %v947_v48 = vadd.f32 %v2477_v34, %v911_v26  ;;  %v948_v12 = vadd.f32 %v2477_v34, %v912_v51  ;;  %v914_v61 = vmul.f32 %v2475_v33, %v2254_v1  ;;  %1883 = vmatprep.subr.bf16.mxu1 %v1963_v57  ;;  %v1964_v1 = vld [vmem:[%s2797_s2 + $0xb8] sm:$0xff]   ;;  %v2587_v33 = vld [vmem:[%s2798_s3 + $0x1] ss:$0 sm:$0xff] }
 0x1c9   : > { %v964_v54 = vpack.c.bf16 %v946_v42, %v945_v14  ;;  %v949_v3 = vadd.f32 %v2477_v34, %v913_v24  ;;  %1884 = vmatpush3.bf16.msra.mxu1 %v1963_v57 }
 0x1ca   : > { %v965_v41 = vpack.c.bf16 %v948_v12, %v947_v48  ;;  %v950_v53 = vadd.f32 %v2477_v34, %v914_v61  ;;  %1885 = vmatprep.subr.bf16.mxu1 %v1964_v1 }
 0x1cc   : > { %v966_v55 = vpack.c.bf16 %v950_v53, %v949_v3 }
 0x1cd   : > { %1848 = vmatmul.mubr.bf16.gmra.mrb[8].mxu0 %v956_v13  ;;  %1886 = vmatpush3.bf16.msra.mxu1 %v1964_v1 }
 0x1ce   : > { %1851 = vmatprep.mubr.bf16.mxu0 %v957_v22 }
 0x1d5   : > { %1852 = vmatmul.mubr.bf16.gmra.mrb[12].mxu0 %v958_v31 }
 0x1d6   : > { %1855 = vmatprep.mubr.bf16.mxu0 %v959_v32 }
 0x1dd   : > { %1856 = vmatmul.mubr.bf16.gmra.mrb[16].mxu0 %v960_v40 }
 0x1de   : > { %1859 = vmatprep.mubr.bf16.mxu0 %v961_v44 }
 0x1e5   : > { %1860 = vmatmul.mubr.bf16.gmra.mrb[20].mxu0 %v962_v5 }
 0x1e6   : > { %1863 = vmatprep.mubr.bf16.mxu0 %v963_v6 }
 0x1ed   : > { %1864 = vmatmul.mubr.bf16.gmra.mrb[24].mxu0 %v964_v54 }
 0x1ee   : > { %1867 = vmatprep.mubr.bf16.mxu0 %v965_v41 }
 0x1f5   : > { %1868 = vmatmul.mubr.bf16.gmra.mrb[28].mxu0 %v966_v55 }
 0x290   : > { %v1841_v34 = vpop.f32.mrb[0].mxu0 }
 0x291   : > { %v1080_v52 = vadd.f32 %v1841_v34, %v2587_v33  ;;  %v1071_v38 = vpop.f32.mrb[1].mxu0 }
 0x292   : > { %v1072_v63 = vadd.f32 %v2587_v33, %v1071_v38  ;;  %v1842_v46 = vpop.f32.mrb[2].mxu0 }
 0x293   : > { %v1200_v19 = vmul.f32 0.33, %v1080_v52  ;;  %v1083_v4 = vadd.f32 %v1842_v46, %v2587_v33  ;;  %v1074_v25 = vpop.f32.mrb[3].mxu0 }
 0x294   : > { %v1198_v62 = vmul.f32 0.33, %v1072_v63  ;;  %v1075_v8 = vadd.f32 %v2587_v33, %v1074_v25 }
 0x295   : > { %v1201_v59 = vmul.f32 0.33, %v1083_v4  ;;  %v1232_v9 = vmax.f32 %v1080_v52, %v1200_v19 }
 0x296   : > { %v1199_v18 = vmul.f32 0.33, %v1075_v8  ;;  %v1230_v60 = vmax.f32 %v1072_v63, %v1198_v62 }
 0x297   : > { %v1233_v13 = vmax.f32 %v1083_v4, %v1201_v59 }
 0x298   : > { %v1845_v23 = vpop.f32.mrb[4].mxu0  ;;  %v1231_v22 = vmax.f32 %v1075_v8, %v1199_v18 }
 0x299   : > { %v1096_v2 = vadd.f32 %v1845_v23, %v2587_v33  ;;  %v1087_v27 = vpop.f32.mrb[5].mxu0  ;;  %v1263_v28 = vpack.c.bf16 %v1233_v13, %v1232_v9 }
 0x29a   : > { %v1088_v21 = vadd.f32 %v2587_v33, %v1087_v27  ;;  %v1846_v29 = vpop.f32.mrb[6].mxu0  ;;  %v1262_v56 = vpack.c.bf16 %v1231_v22, %v1230_v60 }
 0x29b   : > { %v1204_v31 = vmul.f32 0.33, %v1096_v2  ;;  %v1099_v0 = vadd.f32 %v1846_v29, %v2587_v33  ;;  %v1090_v11 = vpop.f32.mrb[7].mxu0 }
 0x29c   : > { %v1202_v32 = vmul.f32 0.33, %v1088_v21  ;;  %v1091_v17 = vadd.f32 %v2587_v33, %v1090_v11  ;;  %1887 = vmatprep.mubr.bf16.mxu1 %v1262_v56 }
 0x29d   : > { %v1205_v30 = vmul.f32 0.33, %v1099_v0  ;;  %1888 = vmatmul.mubr.bf16.vlgmr.msra.gmra.mrb[0].mxu1 %v1263_v28  ;;  %v1236_v49 = vmax.f32 %v1096_v2, %v1204_v31 }
 0x29e   : > { %v1203_v35 = vmul.f32 0.33, %v1091_v17  ;;  %v1234_v7 = vmax.f32 %v1088_v21, %v1202_v32 }
 0x29f   : > { %v1237_v37 = vmax.f32 %v1099_v0, %v1205_v30 }
 0x2a0   : > { %v1235_v40 = vmax.f32 %v1091_v17, %v1203_v35  ;;  %v1849_v15 = vpop.f32.mrb[8].mxu0 }
 0x2a1   : > { %v1112_v43 = vadd.f32 %v1849_v15, %v2587_v33  ;;  %v1103_v44 = vpop.f32.mrb[9].mxu0  ;;  %v1265_v50 = vpack.c.bf16 %v1237_v37, %v1236_v49 }
 0x2a2   : > { %v1104_v36 = vadd.f32 %v2587_v33, %v1103_v44  ;;  %v1850_v45 = vpop.f32.mrb[10].mxu0  ;;  %v1264_v10 = vpack.c.bf16 %v1235_v40, %v1234_v7 }
 0x2a3   : > { %v1208_v16 = vmul.f32 0.33, %v1112_v43  ;;  %v1115_v39 = vadd.f32 %v1850_v45, %v2587_v33  ;;  %v1106_v5 = vpop.f32.mrb[11].mxu0 }
 0x2a4   : > { %v1206_v47 = vmul.f32 0.33, %v1104_v36  ;;  %v1107_v20 = vadd.f32 %v2587_v33, %v1106_v5  ;;  %1891 = vmatprep.mubr.bf16.mxu1 %v1264_v10 }
 0x2a5   : > { %v1209_v6 = vmul.f32 0.33, %v1115_v39  ;;  %1892 = vmatmul.mubr.bf16.gmra.mrb[4].mxu1 %v1265_v50  ;;  %v1240_v51 = vmax.f32 %v1112_v43, %v1208_v16 }
 0x2a6   : > { %v1207_v26 = vmul.f32 0.33, %v1107_v20  ;;  %v1238_v42 = vmax.f32 %v1104_v36, %v1206_v47 }
 0x2a7   : > { %v1241_v14 = vmax.f32 %v1115_v39, %v1209_v6 }
 0x2a8   : > { %v1239_v48 = vmax.f32 %v1107_v20, %v1207_v26  ;;  %v1853_v12 = vpop.f32.mrb[12].mxu0 }
 0x2a9   : > { %v1128_v54 = vadd.f32 %v1853_v12, %v2587_v33  ;;  %v1119_v24 = vpop.f32.mrb[13].mxu0  ;;  %v1267_v61 = vpack.c.bf16 %v1241_v14, %v1240_v51 }
 0x2aa   : > { %v1120_v41 = vadd.f32 %v2587_v33, %v1119_v24  ;;  %v1854_v3 = vpop.f32.mrb[14].mxu0  ;;  %v1266_v53 = vpack.c.bf16 %v1239_v48, %v1238_v42 }
 0x2ab   : > { %v1212_v55 = vmul.f32 0.33, %v1128_v54  ;;  %v1131_v58 = vadd.f32 %v1854_v3, %v2587_v33  ;;  %v1122_v57 = vpop.f32.mrb[15].mxu0 }
 0x2ac   : > { %v1210_v1 = vmul.f32 0.33, %v1120_v41  ;;  %v1123_v34 = vadd.f32 %v2587_v33, %v1122_v57  ;;  %1895 = vmatprep.mubr.bf16.mxu1 %v1266_v53 }
 0x2ad   : > { %v1213_v52 = vmul.f32 0.33, %v1131_v58  ;;  %1896 = vmatmul.mubr.bf16.gmra.mrb[8].mxu1 %v1267_v61  ;;  %v1244_v63 = vmax.f32 %v1128_v54, %v1212_v55 }
 0x2ae   : > { %v1211_v38 = vmul.f32 0.33, %v1123_v34  ;;  %v1242_v19 = vmax.f32 %v1120_v41, %v1210_v1 }
 0x2af   : > { %v1245_v46 = vmax.f32 %v1131_v58, %v1213_v52 }
 0x2b0   : > { %v1243_v4 = vmax.f32 %v1123_v34, %v1211_v38  ;;  %v1857_v25 = vpop.f32.mrb[16].mxu0 }
 0x2b1   : > { %v1144_v62 = vadd.f32 %v1857_v25, %v2587_v33  ;;  %v1135_v8 = vpop.f32.mrb[17].mxu0  ;;  %v1269_v59 = vpack.c.bf16 %v1245_v46, %v1244_v63 }
 0x2b2   : > { %v1136_v18 = vadd.f32 %v2587_v33, %v1135_v8  ;;  %v1858_v9 = vpop.f32.mrb[18].mxu0  ;;  %v1268_v13 = vpack.c.bf16 %v1243_v4, %v1242_v19 }
 0x2b3   : > { %v1216_v23 = vmul.f32 0.33, %v1144_v62  ;;  %v1147_v60 = vadd.f32 %v1858_v9, %v2587_v33  ;;  %v1138_v22 = vpop.f32.mrb[19].mxu0 }
 0x2b4   : > { %v1214_v2 = vmul.f32 0.33, %v1136_v18  ;;  %v1139_v27 = vadd.f32 %v2587_v33, %v1138_v22  ;;  %1899 = vmatprep.mubr.bf16.mxu1 %v1268_v13 }
 0x2b5   : > { %v1217_v28 = vmul.f32 0.33, %v1147_v60  ;;  %1900 = vmatmul.mubr.bf16.gmra.mrb[12].mxu1 %v1269_v59  ;;  %v1248_v29 = vmax.f32 %v1144_v62, %v1216_v23 }
 0x2b6   : > { %v1215_v21 = vmul.f32 0.33, %v1139_v27  ;;  %v1246_v31 = vmax.f32 %v1136_v18, %v1214_v2 }
 0x2b7   : > { %v1249_v56 = vmax.f32 %v1147_v60, %v1217_v28 }
 0x2b8   : > { %v1247_v0 = vmax.f32 %v1139_v27, %v1215_v21  ;;  %v1861_v11 = vpop.f32.mrb[20].mxu0  ;;  %v2624_v27 = vld [vmem:[%s2798_s3 + $0x2] ss:$0 sm:$0xff] }
 0x2b9   : > { %v1160_v32 = vadd.f32 %v1861_v11, %v2587_v33  ;;  %v1151_v17 = vpop.f32.mrb[21].mxu0  ;;  %v1271_v30 = vpack.c.bf16 %v1249_v56, %v1248_v29 }
 0x2ba   : > { %v1152_v35 = vadd.f32 %v2587_v33, %v1151_v17  ;;  %v1862_v49 = vpop.f32.mrb[22].mxu0  ;;  %v1270_v37 = vpack.c.bf16 %v1247_v0, %v1246_v31 }
 0x2bb   : > { %v1220_v7 = vmul.f32 0.33, %v1160_v32  ;;  %v1163_v40 = vadd.f32 %v1862_v49, %v2587_v33  ;;  %v1154_v15 = vpop.f32.mrb[23].mxu0 }
 0x2bc   : > { %v1218_v43 = vmul.f32 0.33, %v1152_v35  ;;  %v1155_v44 = vadd.f32 %v2587_v33, %v1154_v15  ;;  %1903 = vmatprep.mubr.bf16.mxu1 %v1270_v37 }
 0x2bd   : > { %v1221_v50 = vmul.f32 0.33, %v1163_v40  ;;  %1904 = vmatmul.mubr.bf16.gmra.mrb[16].mxu1 %v1271_v30  ;;  %v1252_v45 = vmax.f32 %v1160_v32, %v1220_v7 }
 0x2be   : > { %v1219_v36 = vmul.f32 0.33, %v1155_v44  ;;  %v1250_v16 = vmax.f32 %v1152_v35, %v1218_v43 }
 0x2bf   : > { %v1253_v10 = vmax.f32 %v1163_v40, %v1221_v50 }
 0x2c0   : > { %v1251_v39 = vmax.f32 %v1155_v44, %v1219_v36  ;;  %v1865_v5 = vpop.f32.mrb[24].mxu0 }
 0x2c1   : > { %v1176_v47 = vadd.f32 %v1865_v5, %v2587_v33  ;;  %v1167_v20 = vpop.f32.mrb[25].mxu0  ;;  %v1273_v6 = vpack.c.bf16 %v1253_v10, %v1252_v45 }
 0x2c2   : > { %v1168_v26 = vadd.f32 %v2587_v33, %v1167_v20  ;;  %v1866_v51 = vpop.f32.mrb[26].mxu0  ;;  %v1272_v14 = vpack.c.bf16 %v1251_v39, %v1250_v16 }
 0x2c3   : > { %v1224_v42 = vmul.f32 0.33, %v1176_v47  ;;  %v1179_v48 = vadd.f32 %v1866_v51, %v2587_v33  ;;  %v1170_v12 = vpop.f32.mrb[27].mxu0 }
 0x2c4   : > { %v1222_v54 = vmul.f32 0.33, %v1168_v26  ;;  %v1171_v24 = vadd.f32 %v2587_v33, %v1170_v12  ;;  %1907 = vmatprep.mubr.bf16.mxu1 %v1272_v14 }
 0x2c5   : > { %v1225_v61 = vmul.f32 0.33, %v1179_v48  ;;  %1908 = vmatmul.mubr.bf16.gmra.mrb[20].mxu1 %v1273_v6  ;;  %v1256_v3 = vmax.f32 %v1176_v47, %v1224_v42 }
 0x2c6   : > { %v1223_v41 = vmul.f32 0.33, %v1171_v24  ;;  %v1254_v55 = vmax.f32 %v1168_v26, %v1222_v54 }
 0x2c7   : > { %v1257_v53 = vmax.f32 %v1179_v48, %v1225_v61 }
 0x2c8   : > { %v1255_v58 = vmax.f32 %v1171_v24, %v1223_v41  ;;  %v1869_v57 = vpop.f32.mrb[28].mxu0 }
 0x2c9   : > { %v1192_v1 = vadd.f32 %v1869_v57, %v2587_v33  ;;  %v1183_v34 = vpop.f32.mrb[29].mxu0  ;;  %v1275_v52 = vpack.c.bf16 %v1257_v53, %v1256_v3 }
 0x2ca   : > { %v1184_v38 = vadd.f32 %v2587_v33, %v1183_v34  ;;  %v1870_v63 = vpop.f32.mrb[30].mxu0  ;;  %v1274_v46 = vpack.c.bf16 %v1255_v58, %v1254_v55 }
 0x2cb   : > { %v1228_v19 = vmul.f32 0.33, %v1192_v1  ;;  %v1195_v4 = vadd.f32 %v1870_v63, %v2587_v33  ;;  %v1186_v25 = vpop.f32.mrb[31].mxu0 }
 0x2cc   : > { %v1226_v62 = vmul.f32 0.33, %v1184_v38  ;;  %v1187_v8 = vadd.f32 %v2587_v33, %v1186_v25  ;;  %1911 = vmatprep.mubr.bf16.mxu1 %v1274_v46 }
 0x2cd   : > { %v1229_v59 = vmul.f32 0.33, %v1195_v4  ;;  %1912 = vmatmul.mubr.bf16.gmra.mrb[24].mxu1 %v1275_v52  ;;  %v1260_v9 = vmax.f32 %v1192_v1, %v1228_v19 }
 0x2ce   : > { %v1227_v18 = vmul.f32 0.33, %v1187_v8  ;;  %v1258_v23 = vmax.f32 %v1184_v38, %v1226_v62 }
 0x2cf   : > { %v1261_v13 = vmax.f32 %v1195_v4, %v1229_v59 }
 0x2d0   : > { %v1259_v60 = vmax.f32 %v1187_v8, %v1227_v18 }
 0x2d1   : > { %v1277_v22 = vpack.c.bf16 %v1261_v13, %v1260_v9 }
 0x2d2   : > { %v1276_v2 = vpack.c.bf16 %v1259_v60, %v1258_v23 }
 0x2d4   : > { %1915 = vmatprep.mubr.bf16.mxu1 %v1276_v2 }
 0x2d5   : > { %1916 = vmatmul.mubr.bf16.gmra.mrb[28].mxu1 %v1277_v22 }
 0x370   : > { %v1889_v28 = vpop.f32.mrb[0].mxu1 }
 0x371   : > { %v1391_v33 = vadd.f32 %v1889_v28, %v2624_v27  ;;  %v1382_v21 = vpop.f32.mrb[1].mxu1 }
 0x372   : > { %v1383_v29 = vadd.f32 %v2624_v27, %v1382_v21  ;;  %v1890_v56 = vpop.f32.mrb[2].mxu1 }
 0x373   : > { %1512 = vst.msk [vmem:[%s2799_s4 + $0x10] sm:$0xff] %vm1509_vm1, %v1391_v33  ;;  %v1394_v31 = vadd.f32 %v1890_v56, %v2624_v27  ;;  %v1385_v0 = vpop.f32.mrb[3].mxu1 }
 0x374   : > { %1510 = vst.msk [vmem:[%s2799_s4] sm:$0xff] %vm1509_vm1, %v1383_v29  ;;  %v1386_v11 = vadd.f32 %v2624_v27, %v1385_v0 }
 0x375   : > { %1513 = vst.msk [vmem:[%s2799_s4 + $0x18] sm:$0xff] %vm1509_vm1, %v1394_v31 }
 0x376   : > { %1511 = vst.msk [vmem:[%s2799_s4 + $0x8] sm:$0xff] %vm1509_vm1, %v1386_v11 }
 0x378   : > { %v1893_v32 = vpop.f32.mrb[4].mxu1 }
 0x379   : > { %v1407_v17 = vadd.f32 %v1893_v32, %v2624_v27  ;;  %v1398_v30 = vpop.f32.mrb[5].mxu1 }
 0x37a   : > { %v1399_v35 = vadd.f32 %v2624_v27, %v1398_v30  ;;  %v1894_v49 = vpop.f32.mrb[6].mxu1 }
 0x37b   : > { %1516 = vst.msk [vmem:[%s2799_s4 + $0x30] sm:$0xff] %vm1509_vm1, %v1407_v17  ;;  %v1410_v37 = vadd.f32 %v1894_v49, %v2624_v27  ;;  %v1401_v7 = vpop.f32.mrb[7].mxu1 }
 0x37c   : > { %1514 = vst.msk [vmem:[%s2799_s4 + $0x20] sm:$0xff] %vm1509_vm1, %v1399_v35  ;;  %v1402_v40 = vadd.f32 %v2624_v27, %v1401_v7 }
 0x37d   : > { %1517 = vst.msk [vmem:[%s2799_s4 + $0x38] sm:$0xff] %vm1509_vm1, %v1410_v37 }
 0x37e   : > { %1515 = vst.msk [vmem:[%s2799_s4 + $0x28] sm:$0xff] %vm1509_vm1, %v1402_v40 }
 0x380   : > { %v1897_v15 = vpop.f32.mrb[8].mxu1 }
 0x381   : > { %v1423_v43 = vadd.f32 %v1897_v15, %v2624_v27  ;;  %v1414_v44 = vpop.f32.mrb[9].mxu1 }
 0x382   : > { %v1415_v50 = vadd.f32 %v2624_v27, %v1414_v44  ;;  %v1898_v36 = vpop.f32.mrb[10].mxu1 }
 0x383   : > { %1520 = vst.msk [vmem:[%s2799_s4 + $0x50] sm:$0xff] %vm1509_vm1, %v1423_v43  ;;  %v1426_v45 = vadd.f32 %v1898_v36, %v2624_v27  ;;  %v1417_v10 = vpop.f32.mrb[11].mxu1 }
 0x384   : > { %1518 = vst.msk [vmem:[%s2799_s4 + $0x40] sm:$0xff] %vm1509_vm1, %v1415_v50  ;;  %v1418_v16 = vadd.f32 %v2624_v27, %v1417_v10 }
 0x385   : > { %1521 = vst.msk [vmem:[%s2799_s4 + $0x58] sm:$0xff] %vm1509_vm1, %v1426_v45 }
 0x386   : > { %1519 = vst.msk [vmem:[%s2799_s4 + $0x48] sm:$0xff] %vm1509_vm1, %v1418_v16 }
 0x388   : > { %v1901_v39 = vpop.f32.mrb[12].mxu1 }
 0x389   : > { %v1439_v5 = vadd.f32 %v1901_v39, %v2624_v27  ;;  %v1430_v47 = vpop.f32.mrb[13].mxu1 }
 0x38a   : > { %v1431_v20 = vadd.f32 %v2624_v27, %v1430_v47  ;;  %v1902_v6 = vpop.f32.mrb[14].mxu1 }
 0x38b   : > { %1524 = vst.msk [vmem:[%s2799_s4 + $0x70] sm:$0xff] %vm1509_vm1, %v1439_v5  ;;  %v1442_v26 = vadd.f32 %v1902_v6, %v2624_v27  ;;  %v1433_v51 = vpop.f32.mrb[15].mxu1 }
 0x38c   : > { %1522 = vst.msk [vmem:[%s2799_s4 + $0x60] sm:$0xff] %vm1509_vm1, %v1431_v20  ;;  %v1434_v14 = vadd.f32 %v2624_v27, %v1433_v51 }
 0x38d   : > { %1525 = vst.msk [vmem:[%s2799_s4 + $0x78] sm:$0xff] %vm1509_vm1, %v1442_v26 }
 0x38e   : > { %1523 = vst.msk [vmem:[%s2799_s4 + $0x68] sm:$0xff] %vm1509_vm1, %v1434_v14 }
 0x390   : > { %v1905_v42 = vpop.f32.mrb[16].mxu1 }
 0x391   : > { %v1455_v48 = vadd.f32 %v1905_v42, %v2624_v27  ;;  %v1446_v12 = vpop.f32.mrb[17].mxu1 }
 0x392   : > { %v1447_v54 = vadd.f32 %v2624_v27, %v1446_v12  ;;  %v1906_v24 = vpop.f32.mrb[18].mxu1 }
 0x393   : > { %1528 = vst.msk [vmem:[%s2799_s4 + $0x90] sm:$0xff] %vm1509_vm1, %v1455_v48  ;;  %v1458_v61 = vadd.f32 %v1906_v24, %v2624_v27  ;;  %v1449_v41 = vpop.f32.mrb[19].mxu1 }
 0x394   : > { %1526 = vst.msk [vmem:[%s2799_s4 + $0x80] sm:$0xff] %vm1509_vm1, %v1447_v54  ;;  %v1450_v3 = vadd.f32 %v2624_v27, %v1449_v41 }
 0x395   : > { %1529 = vst.msk [vmem:[%s2799_s4 + $0x98] sm:$0xff] %vm1509_vm1, %v1458_v61 }
 0x396   : > { %1527 = vst.msk [vmem:[%s2799_s4 + $0x88] sm:$0xff] %vm1509_vm1, %v1450_v3 }
 0x398   : > { %v1909_v53 = vpop.f32.mrb[20].mxu1 }
 0x399   : > { %v1471_v55 = vadd.f32 %v1909_v53, %v2624_v27  ;;  %v1462_v58 = vpop.f32.mrb[21].mxu1 }
 0x39a   : > { %v1463_v57 = vadd.f32 %v2624_v27, %v1462_v58  ;;  %v1910_v1 = vpop.f32.mrb[22].mxu1 }
 0x39b   : > { %1532 = vst.msk [vmem:[%s2799_s4 + $0xb0] sm:$0xff] %vm1509_vm1, %v1471_v55  ;;  %v1474_v34 = vadd.f32 %v1910_v1, %v2624_v27  ;;  %v1465_v52 = vpop.f32.mrb[23].mxu1 }
 0x39c   : > { %1530 = vst.msk [vmem:[%s2799_s4 + $0xa0] sm:$0xff] %vm1509_vm1, %v1463_v57  ;;  %v1466_v38 = vadd.f32 %v2624_v27, %v1465_v52 }
 0x39d   : > { %1533 = vst.msk [vmem:[%s2799_s4 + $0xb8] sm:$0xff] %vm1509_vm1, %v1474_v34 }
 0x39e   : > { %1531 = vst.msk [vmem:[%s2799_s4 + $0xa8] sm:$0xff] %vm1509_vm1, %v1466_v38 }
 0x3a0   : > { %v1913_v63 = vpop.f32.mrb[24].mxu1 }
 0x3a1   : > { %v1487_v46 = vadd.f32 %v1913_v63, %v2624_v27  ;;  %v1478_v19 = vpop.f32.mrb[25].mxu1 }
 0x3a2   : > { %v1479_v4 = vadd.f32 %v2624_v27, %v1478_v19  ;;  %v1914_v25 = vpop.f32.mrb[26].mxu1 }
 0x3a3   : > { %1536 = vst.msk [vmem:[%s2799_s4 + $0xd0] sm:$0xff] %vm1509_vm1, %v1487_v46  ;;  %v1490_v62 = vadd.f32 %v1914_v25, %v2624_v27  ;;  %v1481_v8 = vpop.f32.mrb[27].mxu1 }
 0x3a4   : > { %1534 = vst.msk [vmem:[%s2799_s4 + $0xc0] sm:$0xff] %vm1509_vm1, %v1479_v4  ;;  %v1482_v59 = vadd.f32 %v2624_v27, %v1481_v8 }
 0x3a5   : > { %1537 = vst.msk [vmem:[%s2799_s4 + $0xd8] sm:$0xff] %vm1509_vm1, %v1490_v62 }
 0x3a6   : > { %1535 = vst.msk [vmem:[%s2799_s4 + $0xc8] sm:$0xff] %vm1509_vm1, %v1482_v59 }
 0x3a8   : > { %v1917_v18 = vpop.f32.mrb[28].mxu1 }
 0x3a9   : > { %v1503_v9 = vadd.f32 %v1917_v18, %v2624_v27  ;;  %v1494_v13 = vpop.f32.mrb[29].mxu1 }
 0x3aa   : > { %v1495_v23 = vadd.f32 %v2624_v27, %v1494_v13  ;;  %v1918_v60 = vpop.f32.mrb[30].mxu1 }
 0x3ab   : > { %1540 = vst.msk [vmem:[%s2799_s4 + $0xf0] sm:$0xff] %vm1509_vm1, %v1503_v9  ;;  %v1506_v22 = vadd.f32 %v1918_v60, %v2624_v27  ;;  %v1497_v2 = vpop.f32.mrb[31].mxu1 }
 0x3ac   : > { %1538 = vst.msk [vmem:[%s2799_s4 + $0xe0] sm:$0xff] %vm1509_vm1, %v1495_v23  ;;  %v1498_v28 = vadd.f32 %v2624_v27, %v1497_v2 }
 0x3ad   : > { %1541 = vst.msk [vmem:[%s2799_s4 + $0xf8] sm:$0xff] %vm1509_vm1, %v1506_v22 }
 0x3ae   : > { %1539 = vst.msk [vmem:[%s2799_s4 + $0xe8] sm:$0xff] %vm1509_vm1, %v1498_v28 }
 0x3af PF: > { %s15_s19 = sadd.s32 1, %s1991_s19   ;;  %s2800_s17 = smov %s1987_s18 }
 0x3b0   : > { %p12_p7 = scmp.ge.s32.totalorder %s15_s19, 4   ;;  %s2801_s18 = smov %s2803_s0 }
 0x3b2   :  { %14 = sbr.rel (!%p12_p7) target bundleno = 2 (0x2), region = 76 }

</bundles_post_ra>
